<compile_context>
chip_gen: v7x
topology: tpu7x:2x2x1
jax: 0.10.0
libtpu: 0.0.40
codegen_flags: <defaults>
</compile_context>

<pallas_src>
import functools
import math

import jax
import jax.numpy as jnp
import numpy as np
from jax import lax
from jax.experimental import pallas as pl
from jax.experimental.pallas import tpu as pltpu


def _round_up(x, m):
    return ((x + m - 1) // m) * m


def diffpool_kernel(a_ref, h_ref, w_ref, b_ref, bm_ref,
                    adj_ref, hpool_ref,
                    agg_ref, sfull_ref,
                    *, tile_n, num_graphs):
    p = pl.program_id(0)                      # phase: 0 = aggregate, 1 = assign + pool
    t = pl.program_id(1)                      # node row-tile index
    row0 = pl.multiple_of(t * tile_n, tile_n)

    # contract leading dims of both operands: X^T @ Y without an explicit transpose
    dn_col = (((0,), (0,)), ((), ()))

    # ---------------- phase 0: agg = A^T @ [1 | h]  (streamed over A row tiles) ----------
    @pl.when(jnp.logical_and(p == 0, t == 0))
    def _init_agg():
        agg_ref[...] = jnp.zeros_like(agg_ref)

    @pl.when(p == 0)
    def _phase0():
        a_tile = a_ref[...]                               # (TN, Np)  bf16
        h_tile = h_ref[pl.ds(row0, tile_n), :]            # (TN, Dp)  bf16 (col 0 holds ones)
        agg_ref[...] += lax.dot_general(
            a_tile, h_tile, dn_col, preferred_element_type=jnp.float32)

    # -------- phase 1, first step: GCN fc + softmax + block-diag assignment --------------
    @pl.when(jnp.logical_and(p == 1, t == 0))
    def _assign():
        agg = agg_ref[...]                                # (Np, Dp) f32; column 0 = in-degree
        indeg = agg[:, :1]                                # (Np, 1)  fused in-degree
        inv_deg = pl.reciprocal(jnp.maximum(indeg, 1.0), approx=True)
        ft = agg * inv_deg                                # mean over incoming edges
        logits = jnp.dot(ft, w_ref[...],
                         preferred_element_type=jnp.float32) + b_ref[...]
        m = jnp.max(logits, axis=-1, keepdims=True)
        e = jnp.exp(logits - m)
        s = e * pl.reciprocal(jnp.sum(e, axis=-1, keepdims=True), approx=True)
        # block_diag(split(S)) == lane-replicate S across graphs and mask by membership
        sfull_ref[...] = (jnp.tile(s, (1, num_graphs)).astype(jnp.bfloat16)
                          * bm_ref[...])                  # (Np, B*Kp) bf16
        adj_ref[...] = jnp.zeros_like(adj_ref)
        hpool_ref[...] = jnp.zeros_like(hpool_ref)

    # -------- phase 1: stream A row tiles, accumulate adj and h_pool ---------------------
    @pl.when(p == 1)
    def _phase1():
        a_tile = a_ref[...]                               # (TN, Np)   bf16
        s_full = sfull_ref[...]                           # (Np, BKp)  bf16
        as_t = jnp.dot(a_tile, s_full,
                       preferred_element_type=jnp.float32)            # (TN, BKp) f32
        s_rows = sfull_ref[pl.ds(row0, tile_n), :]        # (TN, BKp)  bf16
        h_rows = h_ref[pl.ds(row0, tile_n), :]            # (TN, Dp)   bf16
        adj_ref[...] += lax.dot_general(
            s_rows, as_t.astype(jnp.bfloat16), dn_col,
            preferred_element_type=jnp.float32)
        hpool_ref[...] += lax.dot_general(
            s_rows, h_rows, dn_col, preferred_element_type=jnp.float32)


def diffpool_forward(A, h, W_fc, b_fc, batch_num_nodes):
    """DiffPool forward. Returns (adj_new [B*K, B*K], h_batched [B, K, D])."""
    N, D = h.shape
    K = W_fc.shape[1]
    counts = [int(c) for c in batch_num_nodes]
    B = len(counts)
    assert sum(counts) == N

    # ---- padded / tiled sizes (lane-dense: last dims are multiples of 128) ----
    TN = 512                                          # A row tile; >=512 amortizes step overhead
    Np = _round_up(N, 128)
    if Np < TN:
        TN = Np
    else:
        Np = _round_up(Np, TN)
    n_tiles = Np // TN

    Dp = _round_up(D + 1, 128)                        # +1: fused ones column (in-degree)
    Kp = _round_up(K, 128 // math.gcd(B, 128))        # per-graph stride; B*Kp % 128 == 0
    BKp = B * Kp

    # ---- padded operands (A / h / mask in bf16; A and mask are 0/1 -> exact) ----
    A_pad = jnp.zeros((Np, Np), jnp.float32).at[:N, :N].set(A).astype(jnp.bfloat16)
    h_pad = (jnp.zeros((Np, Dp), jnp.float32)
             .at[:N, 0].set(1.0)                      # ones column -> in-degree from same matmul
             .at[:N, 1:D + 1].set(h)
             .astype(jnp.bfloat16))
    W_pad = jnp.zeros((Dp, Kp), jnp.float32).at[1:D + 1, :K].set(W_fc)
    b_pad = jnp.full((1, Kp), -1e30, jnp.float32).at[:, :K].set(b_fc)  # kill padded clusters

    # graph-membership mask for the in-kernel block_diag (structural, host-built)
    gid = np.full((Np,), -1, np.int64)
    gid[:N] = np.repeat(np.arange(B), counts)
    cols = np.arange(BKp)
    bm_np = ((gid[:, None] == (cols // Kp)[None, :]) &
             ((cols % Kp)[None, :] < K)).astype(np.float32)
    BM = jnp.asarray(bm_np, dtype=jnp.bfloat16)

    kernel = functools.partial(diffpool_kernel, tile_n=TN, num_graphs=B)

    flops = (2 * Np * Np * Dp + 2 * Np * Dp * Kp + 2 * Np * Np * BKp
             + 2 * Np * BKp * BKp + 2 * Np * BKp * Dp)
    bytes_accessed = (2 * Np * Np * 2 + Np * Dp * 2 + Np * BKp * 2
                      + Dp * Kp * 4 + Kp * 4 + BKp * BKp * 4 + BKp * Dp * 4)
    vmem_est = (2 * TN * Np * 2 + Np * Dp * 2 + Np * BKp * 2 + Dp * Kp * 4 + Kp * 4
                + Np * Dp * 4 + Np * BKp * 2 + BKp * BKp * 4 + BKp * Dp * 4)
    vmem_limit = int(min(max(2 * vmem_est, 32 * 1024 * 1024), 64 * 1024 * 1024))

    adj_pad, hpool_pad = pl.pallas_call(
        kernel,
        out_shape=(jax.ShapeDtypeStruct((BKp, BKp), jnp.float32),
                   jax.ShapeDtypeStruct((BKp, Dp), jnp.float32)),
        grid_spec=pltpu.PrefetchScalarGridSpec(
            num_scalar_prefetch=0,
            grid=(2, n_tiles),
            in_specs=[
                pl.BlockSpec((TN, Np), lambda p, t: (t, 0)),    # A row tiles (streamed, 2 passes)
                pl.BlockSpec((Np, Dp), lambda p, t: (0, 0)),    # [1 | h]   (resident)
                pl.BlockSpec((Dp, Kp), lambda p, t: (0, 0)),    # W_fc
                pl.BlockSpec((1, Kp), lambda p, t: (0, 0)),     # b_fc
                pl.BlockSpec((Np, BKp), lambda p, t: (0, 0)),   # block-diag membership mask
            ],
            out_specs=(
                pl.BlockSpec((BKp, BKp), lambda p, t: (0, 0)),  # adj accumulator (resident)
                pl.BlockSpec((BKp, Dp), lambda p, t: (0, 0)),   # h_pool accumulator (resident)
            ),
            scratch_shapes=[
                pltpu.VMEM((Np, Dp), jnp.float32),              # agg = A^T @ [1 | h]
                pltpu.VMEM((Np, BKp), jnp.bfloat16),            # S_full (resident assignment)
            ]),
        compiler_params=pltpu.CompilerParams(
            dimension_semantics=("arbitrary", "arbitrary"),
            vmem_limit_bytes=vmem_limit),
        cost_estimate=pl.CostEstimate(flops=flops, transcendentals=Np * Kp,
                                      bytes_accessed=bytes_accessed),
    )(A_pad, h_pad, W_pad, b_pad, BM)

    # strip padding: padded clusters (k >= K) and padded feature lanes are exact zeros
    adj_new = adj_pad.reshape(B, Kp, B, Kp)[:, :K, :, :K].reshape(B * K, B * K)
    h_batched = hpool_pad.reshape(B, Kp, Dp)[:, :K, 1:D + 1]   # batch2tensor on pooled features
    return adj_new, h_batched


def diffpool_reference(A, h, W_fc, b_fc, batch_num_nodes):
    """Pure-JAX f32 reference of the PyTorch module forward."""
    counts = [int(c) for c in batch_num_nodes]
    B = len(counts)
    K = W_fc.shape[1]
    indeg = jnp.sum(A, axis=0, keepdims=True).T
    ft = (A.T @ h) / jnp.maximum(indeg, 1.0)
    S = jax.nn.softmax(ft @ W_fc + b_fc, axis=1)
    gid = jnp.asarray(np.repeat(np.arange(B), counts))
    BM = (gid[:, None] == (jnp.arange(B * K) // K)[None, :]).astype(jnp.float32)
    S_full = jnp.tile(S, (1, B)) * BM                  # == block_diag(split(S, counts))
    h_pool = S_full.T @ h
    adj_new = S_full.T @ (A @ S_full)
    return adj_new, h_pool.reshape(B, K, h.shape[1])


if __name__ == "__main__":
    # small, module-consistent shapes
    B = 2                 # graphs in the batch
    n_per = 8             # nodes per graph
    N = B * n_per         # 16 total nodes
    D = 32                # input_dim
    K = 4                 # assign_dim (clusters per graph)

    key = jax.random.PRNGKey(0)
    k_adj, k_h, k_w, k_b = jax.random.split(key, 4)

    # deterministic batched graph: block-diagonal random adjacency (no cross-graph edges)
    same_graph = (jnp.arange(N)[:, None] // n_per) == (jnp.arange(N)[None, :] // n_per)
    A = (jax.random.bernoulli(k_adj, 0.4, (N, N)) & same_graph).astype(jnp.float32)

    h = jax.random.normal(k_h, (N, D), dtype=jnp.float32)

    # GCN fc parameters (nn.Linear(input_dim, assign_dim))
    W_fc = 0.1 * jax.random.normal(k_w, (D, K), dtype=jnp.float32)
    b_fc = 0.1 * jax.random.normal(k_b, (1, K), dtype=jnp.float32)

    counts = [n_per] * B  # g.batch_num_nodes()

    adj_new, h_batched = diffpool_forward(A, h, W_fc, b_fc, counts)
    jax.block_until_ready((adj_new, h_batched))

    adj_expect, h_expect = diffpool_reference(A, h, W_fc, b_fc, counts)
    assert adj_new.shape == (B * K, B * K) and h_batched.shape == (B, K, D)
    # bf16 operands + approx reciprocal -> loose tolerance vs f32 reference
    assert jnp.allclose(adj_new, adj_expect, atol=5e-2, rtol=5e-2), \
        float(jnp.max(jnp.abs(adj_new - adj_expect)))
    assert jnp.allclose(h_batched, h_expect, atol=5e-2, rtol=5e-2), \
        float(jnp.max(jnp.abs(h_batched - h_expect)))

    print("KERNEL_OK")
</pallas_src>

<mosaic_0001>
module attributes {stable_mosaic.version = 11 : i64} {
  func.func @diffpool_kernel(%arg0: i32, %arg1: i32, %arg2: memref<128x128xbf16, #tpu.memory_space<vmem>>, %arg3: memref<128x128xbf16, #tpu.memory_space<vmem>>, %arg4: memref<128x64xf32, #tpu.memory_space<vmem>>, %arg5: memref<1x64xf32, #tpu.memory_space<vmem>>, %arg6: memref<128x128xbf16, #tpu.memory_space<vmem>>, %arg7: memref<128x128xf32, #tpu.memory_space<vmem>>, %arg8: memref<128x128xf32, #tpu.memory_space<vmem>>, %arg9: memref<128x128xf32, #tpu.memory_space<vmem>>, %arg10: memref<128x128xbf16, #tpu.memory_space<vmem>>) attributes {dimension_semantics = [#tpu.dimension_semantics<arbitrary>, #tpu.dimension_semantics<arbitrary>], iteration_bounds = array<i64: 2, 1>, scalar_prefetch = 0 : i64, scratch_operands = 2 : i64, tpu.core_type = #tpu.core_type<tc>, window_params = [{transform_indices = @transform_0, window_bounds = array<i64: 128, 128>}, {pipeline_mode = #tpu.pipeline_mode<synchronous>, transform_indices = @transform_1, window_bounds = array<i64: 128, 128>}, {pipeline_mode = #tpu.pipeline_mode<synchronous>, transform_indices = @transform_2, window_bounds = array<i64: 128, 64>}, {pipeline_mode = #tpu.pipeline_mode<synchronous>, transform_indices = @transform_3, window_bounds = array<i64: 1, 64>}, {pipeline_mode = #tpu.pipeline_mode<synchronous>, transform_indices = @transform_4, window_bounds = array<i64: 128, 128>}, {pipeline_mode = #tpu.pipeline_mode<synchronous>, transform_indices = @transform_5, window_bounds = array<i64: 128, 128>}, {pipeline_mode = #tpu.pipeline_mode<synchronous>, transform_indices = @transform_6, window_bounds = array<i64: 128, 128>}]} {
    %c128_i32 = arith.constant 128 : i32
    %0 = arith.muli %arg1, %c128_i32 : i32
    %1 = tpu.assume_multiple %0, 128 : i32
    %c0_i32 = arith.constant 0 : i32
    %2 = arith.cmpi eq, %arg0, %c0_i32 : i32
    %c0_i32_0 = arith.constant 0 : i32
    %3 = arith.cmpi eq, %arg1, %c0_i32_0 : i32
    %4 = arith.andi %2, %3 : i1
    %5 = arith.extui %4 : i1 to i32
    %c0_i32_1 = arith.constant 0 : i32
    %6 = arith.cmpi ne, %5, %c0_i32_1 : i32
    scf.if %6 {
      %cst = arith.constant 0.000000e+00 : f32
      %18 = vector.broadcast %cst : f32 to vector<128x128xf32>
      %c0 = arith.constant 0 : index
      %c0_8 = arith.constant 0 : index
      %19 = vector.load %arg9[%c0, %c0_8] : memref<128x128xf32, #tpu.memory_space<vmem>>, vector<128x128xf32>
      tpu.vector_store %arg9[%c0, %c0_8], %18 {strides = array<i32>} : memref<128x128xf32, #tpu.memory_space<vmem>>, vector<128x128xf32>,
    } else {
    }
    %c0_i32_2 = arith.constant 0 : i32
    %7 = arith.cmpi eq, %arg0, %c0_i32_2 : i32
    %8 = arith.extui %7 : i1 to i32
    %c0_i32_3 = arith.constant 0 : i32
    %9 = arith.cmpi ne, %8, %c0_i32_3 : i32
    scf.if %9 {
      %c0 = arith.constant 0 : index
      %c0_8 = arith.constant 0 : index
      %18 = vector.load %arg2[%c0, %c0_8] : memref<128x128xbf16, #tpu.memory_space<vmem>>, vector<128x128xbf16>
      %19 = arith.index_cast %1 : i32 to index
      %c0_9 = arith.constant 0 : index
      %20 = vector.load %arg3[%19, %c0_9] : memref<128x128xbf16, #tpu.memory_space<vmem>>, vector<128x128xbf16>
      %c0_10 = arith.constant 0 : index
      %c0_11 = arith.constant 0 : index
      %21 = vector.load %arg9[%c0_10, %c0_11] : memref<128x128xf32, #tpu.memory_space<vmem>>, vector<128x128xf32>
      %cst = arith.constant dense<0.000000e+00> : vector<128x128xf32>
      %22 = tpu.matmul %18, %20, %cst {dimension_numbers = #tpu.dot_dimension_numbers<[0], [0], [1], [1], [0, 1, 1, 1], [], []>} : vector<128x128xbf16>, vector<128x128xbf16>, vector<128x128xf32> -> vector<128x128xf32>
      %23 = arith.addf %21, %22 : vector<128x128xf32>
      %c0_12 = arith.constant 0 : index
      %c0_13 = arith.constant 0 : index
      %24 = vector.load %arg9[%c0_12, %c0_13] : memref<128x128xf32, #tpu.memory_space<vmem>>, vector<128x128xf32>
      tpu.vector_store %arg9[%c0_12, %c0_13], %23 {strides = array<i32>} : memref<128x128xf32, #tpu.memory_space<vmem>>, vector<128x128xf32>,
    } else {
    }
    %c1_i32 = arith.constant 1 : i32
    %10 = arith.cmpi eq, %arg0, %c1_i32 : i32
    %c0_i32_4 = arith.constant 0 : i32
    %11 = arith.cmpi eq, %arg1, %c0_i32_4 : i32
    %12 = arith.andi %10, %11 : i1
    %13 = arith.extui %12 : i1 to i32
    %c0_i32_5 = arith.constant 0 : i32
    %14 = arith.cmpi ne, %13, %c0_i32_5 : i32
    scf.if %14 {
      %c0 = arith.constant 0 : index
      %c0_8 = arith.constant 0 : index
      %18 = vector.load %arg9[%c0, %c0_8] : memref<128x128xf32, #tpu.memory_space<vmem>>, vector<128x128xf32>
      %19 = vector.extract_strided_slice %18 {offsets = [0, 0], sizes = [128, 1], strides = [1, 1]} : vector<128x128xf32> to vector<128x1xf32>
      %cst = arith.constant 1.000000e+00 : f32
      %20 = vector.broadcast %cst : f32 to vector<128x1xf32>
      %21 = arith.maximumf %19, %20 : vector<128x1xf32>
      %22 = tpu.reciprocal %21 {approx = true} : vector<128x1xf32> -> vector<128x1xf32>
      %23 = vector.broadcast %22 : vector<128x1xf32> to vector<128x128xf32>
      %24 = arith.mulf %18, %23 : vector<128x128xf32>
      %c0_9 = arith.constant 0 : index
      %c0_10 = arith.constant 0 : index
      %25 = vector.load %arg4[%c0_9, %c0_10] : memref<128x64xf32, #tpu.memory_space<vmem>>, vector<128x64xf32>
      %cst_11 = arith.constant dense<0.000000e+00> : vector<128x64xf32>
      %26 = tpu.matmul %24, %25, %cst_11 {dimension_numbers = #tpu.dot_dimension_numbers<[1], [0], [0], [1], [0, 0, 1, 1], [], []>} : vector<128x128xf32>, vector<128x64xf32>, vector<128x64xf32> -> vector<128x64xf32>
      %c0_12 = arith.constant 0 : index
      %c0_13 = arith.constant 0 : index
      %27 = vector.load %arg5[%c0_12, %c0_13] : memref<1x64xf32, #tpu.memory_space<vmem>>, vector<1x64xf32>
      %28 = vector.broadcast %27 : vector<1x64xf32> to vector<128x64xf32>
      %29 = arith.addf %26, %28 : vector<128x64xf32>
      %cst_14 = arith.constant dense<0xFF800000> : vector<128xf32>
      %30 = vector.multi_reduction <maximumf>, %29, %cst_14 [1] : vector<128x64xf32> to vector<128xf32>
      %31 = vector.shape_cast %30 : vector<128xf32> to vector<128x1xf32>
      %32 = vector.broadcast %31 : vector<128x1xf32> to vector<128x64xf32>
      %33 = arith.subf %29, %32 : vector<128x64xf32>
      %34 = math.exp %33 : vector<128x64xf32>
      %cst_15 = arith.constant dense<0.000000e+00> : vector<128xf32>
      %35 = vector.multi_reduction <add>, %34, %cst_15 [1] : vector<128x64xf32> to vector<128xf32>
      %36 = vector.shape_cast %35 : vector<128xf32> to vector<128x1xf32>
      %37 = tpu.reciprocal %36 {approx = true} : vector<128x1xf32> -> vector<128x1xf32>
      %38 = vector.broadcast %37 : vector<128x1xf32> to vector<128x64xf32>
      %39 = arith.mulf %34, %38 : vector<128x64xf32>
      %40 = tpu.concatenate %39, %39 in 1 : vector<128x64xf32>, vector<128x64xf32> -> vector<128x128xf32>
      %41 = arith.truncf %40 : vector<128x128xf32> to vector<128x128xbf16>
      %c0_16 = arith.constant 0 : index
      %c0_17 = arith.constant 0 : index
      %42 = vector.load %arg6[%c0_16, %c0_17] : memref<128x128xbf16, #tpu.memory_space<vmem>>, vector<128x128xbf16>
      %43 = arith.mulf %41, %42 : vector<128x128xbf16>
      %c0_18 = arith.constant 0 : index
      %c0_19 = arith.constant 0 : index
      %44 = vector.load %arg10[%c0_18, %c0_19] : memref<128x128xbf16, #tpu.memory_space<vmem>>, vector<128x128xbf16>
      tpu.vector_store %arg10[%c0_18, %c0_19], %43 {strides = array<i32>} : memref<128x128xbf16, #tpu.memory_space<vmem>>, vector<128x128xbf16>,
      %cst_20 = arith.constant 0.000000e+00 : f32
      %45 = vector.broadcast %cst_20 : f32 to vector<128x128xf32>
      %c0_21 = arith.constant 0 : index
      %c0_22 = arith.constant 0 : index
      %46 = vector.load %arg7[%c0_21, %c0_22] : memref<128x128xf32, #tpu.memory_space<vmem>>, vector<128x128xf32>
      tpu.vector_store %arg7[%c0_21, %c0_22], %45 {strides = array<i32>} : memref<128x128xf32, #tpu.memory_space<vmem>>, vector<128x128xf32>,
      %cst_23 = arith.constant 0.000000e+00 : f32
      %47 = vector.broadcast %cst_23 : f32 to vector<128x128xf32>
      %c0_24 = arith.constant 0 : index
      %c0_25 = arith.constant 0 : index
      %48 = vector.load %arg8[%c0_24, %c0_25] : memref<128x128xf32, #tpu.memory_space<vmem>>, vector<128x128xf32>
      tpu.vector_store %arg8[%c0_24, %c0_25], %47 {strides = array<i32>} : memref<128x128xf32, #tpu.memory_space<vmem>>, vector<128x128xf32>,
    } else {
    }
    %c1_i32_6 = arith.constant 1 : i32
    %15 = arith.cmpi eq, %arg0, %c1_i32_6 : i32
    %16 = arith.extui %15 : i1 to i32
    %c0_i32_7 = arith.constant 0 : i32
    %17 = arith.cmpi ne, %16, %c0_i32_7 : i32
    scf.if %17 {
      %c0 = arith.constant 0 : index
      %c0_8 = arith.constant 0 : index
      %18 = vector.load %arg2[%c0, %c0_8] : memref<128x128xbf16, #tpu.memory_space<vmem>>, vector<128x128xbf16>
      %c0_9 = arith.constant 0 : index
      %c0_10 = arith.constant 0 : index
      %19 = vector.load %arg10[%c0_9, %c0_10] : memref<128x128xbf16, #tpu.memory_space<vmem>>, vector<128x128xbf16>
      %cst = arith.constant dense<0.000000e+00> : vector<128x128xf32>
      %20 = tpu.matmul %18, %19, %cst {dimension_numbers = #tpu.dot_dimension_numbers<[1], [0], [0], [1], [0, 0, 1, 1], [], []>} : vector<128x128xbf16>, vector<128x128xbf16>, vector<128x128xf32> -> vector<128x128xf32>
      %21 = arith.index_cast %1 : i32 to index
      %c0_11 = arith.constant 0 : index
      %22 = vector.load %arg10[%21, %c0_11] : memref<128x128xbf16, #tpu.memory_space<vmem>>, vector<128x128xbf16>
      %23 = arith.index_cast %1 : i32 to index
      %c0_12 = arith.constant 0 : index
      %24 = vector.load %arg3[%23, %c0_12] : memref<128x128xbf16, #tpu.memory_space<vmem>>, vector<128x128xbf16>
      %c0_13 = arith.constant 0 : index
      %c0_14 = arith.constant 0 : index
      %25 = vector.load %arg7[%c0_13, %c0_14] : memref<128x128xf32, #tpu.memory_space<vmem>>, vector<128x128xf32>
      %26 = arith.truncf %20 : vector<128x128xf32> to vector<128x128xbf16>
      %cst_15 = arith.constant dense<0.000000e+00> : vector<128x128xf32>
      %27 = tpu.matmul %22, %26, %cst_15 {dimension_numbers = #tpu.dot_dimension_numbers<[0], [0], [1], [1], [0, 1, 1, 1], [], []>} : vector<128x128xbf16>, vector<128x128xbf16>, vector<128x128xf32> -> vector<128x128xf32>
      %28 = arith.addf %25, %27 : vector<128x128xf32>
      %c0_16 = arith.constant 0 : index
      %c0_17 = arith.constant 0 : index
      %29 = vector.load %arg7[%c0_16, %c0_17] : memref<128x128xf32, #tpu.memory_space<vmem>>, vector<128x128xf32>
      tpu.vector_store %arg7[%c0_16, %c0_17], %28 {strides = array<i32>} : memref<128x128xf32, #tpu.memory_space<vmem>>, vector<128x128xf32>,
      %c0_18 = arith.constant 0 : index
      %c0_19 = arith.constant 0 : index
      %30 = vector.load %arg8[%c0_18, %c0_19] : memref<128x128xf32, #tpu.memory_space<vmem>>, vector<128x128xf32>
      %cst_20 = arith.constant dense<0.000000e+00> : vector<128x128xf32>
      %31 = tpu.matmul %22, %24, %cst_20 {dimension_numbers = #tpu.dot_dimension_numbers<[0], [0], [1], [1], [0, 1, 1, 1], [], []>} : vector<128x128xbf16>, vector<128x128xbf16>, vector<128x128xf32> -> vector<128x128xf32>
      %32 = arith.addf %30, %31 : vector<128x128xf32>
      %c0_21 = arith.constant 0 : index
      %c0_22 = arith.constant 0 : index
      %33 = vector.load %arg8[%c0_21, %c0_22] : memref<128x128xf32, #tpu.memory_space<vmem>>, vector<128x128xf32>
      tpu.vector_store %arg8[%c0_21, %c0_22], %32 {strides = array<i32>} : memref<128x128xf32, #tpu.memory_space<vmem>>, vector<128x128xf32>,
    } else {
    }
    return
  }
  func.func @transform_0(%arg0: i32, %arg1: i32) -> (i32, i32) {
    %c0_i32 = arith.constant 0 : i32
    %c0_i32_0 = arith.constant 0 : i32
    return %arg1, %c0_i32 : i32, i32
  }
  func.func @transform_1(%arg0: i32, %arg1: i32) -> (i32, i32) {
    %c0_i32 = arith.constant 0 : i32
    %c0_i32_0 = arith.constant 0 : i32
    %c0_i32_1 = arith.constant 0 : i32
    return %c0_i32, %c0_i32_0 : i32, i32
  }
  func.func @transform_2(%arg0: i32, %arg1: i32) -> (i32, i32) {
    %c0_i32 = arith.constant 0 : i32
    %c0_i32_0 = arith.constant 0 : i32
    %c0_i32_1 = arith.constant 0 : i32
    return %c0_i32, %c0_i32_0 : i32, i32
  }
  func.func @transform_3(%arg0: i32, %arg1: i32) -> (i32, i32) {
    %c0_i32 = arith.constant 0 : i32
    %c0_i32_0 = arith.constant 0 : i32
    %c0_i32_1 = arith.constant 0 : i32
    return %c0_i32, %c0_i32_0 : i32, i32
  }
  func.func @transform_4(%arg0: i32, %arg1: i32) -> (i32, i32) {
    %c0_i32 = arith.constant 0 : i32
    %c0_i32_0 = arith.constant 0 : i32
    %c0_i32_1 = arith.constant 0 : i32
    return %c0_i32, %c0_i32_0 : i32, i32
  }
  func.func @transform_5(%arg0: i32, %arg1: i32) -> (i32, i32) {
    %c0_i32 = arith.constant 0 : i32
    %c0_i32_0 = arith.constant 0 : i32
    %c0_i32_1 = arith.constant 0 : i32
    return %c0_i32, %c0_i32_0 : i32, i32
  }
  func.func @transform_6(%arg0: i32, %arg1: i32) -> (i32, i32) {
    %c0_i32 = arith.constant 0 : i32
    %c0_i32_0 = arith.constant 0 : i32
    %c0_i32_1 = arith.constant 0 : i32
    return %c0_i32, %c0_i32_0 : i32, i32
  }
}

</mosaic_0001>

<bundles_post_ra>
// kernel: tpu_custom_call.1
= control target key start
LH: loop header
LB: loop body
LE: loop exit
PB: predicated region body
PF: predicated region fallthrough
CT: control target
= control target key end

     0   :  { %12 = vsyncpa [#allocation5], 0  ;;  %s3302_s0 = inlined_call_operand.vmem [shape: bf16[128,128], index: 0, kind: input, shape index: {}]   ;;  %s3303_s1 = inlined_call_operand.vmem [shape: bf16[128,128], index: 1, kind: input, shape index: {}]   ;;  %s3304_s2 = inlined_call_operand.vmem [shape: f32[128,64], index: 2, kind: input, shape index: {}]   ;;  %s3305_s3 = inlined_call_operand.vmem [shape: f32[1,64], index: 3, kind: input, shape index: {}]   ;;  %s3306_s4 = inlined_call_operand.vmem [shape: bf16[128,128], index: 4, kind: input, shape index: {}]   ;;  %s3307_s5 = inlined_call_operand.hbm [shape: f32[128,128], index: 5, kind: output, shape index: {0}]   ;;  %s3308_s6 = inlined_call_operand.hbm [shape: f32[128,128], index: 6, kind: output, shape index: {1}]  }
   0x1   :  { %13 = vsyncpa [#allocation7], 0  ;;  %s2687_s21 = smov 0   ;;  %s2689_s22 = smov 0  }
   0x2   :  { %s2691_s23 = smov 0  }
   0x3 LB: > { %s1921_s24 = sadd.s32 4294967295, %s2642_s23   ;;  %s31_s25 = sadd.s32 1, %s2638_s22  ;;  %s2642_s23 = sphi %s2691_s23, %s19_s23   ;;  %s2638_s22 = sphi %s2689_s22, %s3311_s22   ;;  %s2634_s21 = sphi %s2687_s21, %s3310_s21  }
   0x4   : > { %p33_p0 = scmp.ge.s32.totalorder %s31_s25, 2  ;;  %p1924_p1 = scmp.ge.s32.totalorder %s2642_s23, 1 }
   0x5   : > { %p220_p2 = scmp.lt.s32.totalorder %s2642_s23, 3 }
   0x6   : > { %s3313_s25 = smov (%p33_p0, %s31_s25), 0 }
   0x7   : > { %p221_p3 = pnand %p1924_p1, %p220_p2 }
   0x8   : > { %p253_p4 = scmp.eq.s32.totalorder (!%p221_p3), %s2634_s21, 0 }
   0x9   : > { %224 = sbr.rel (%p221_p3) target bundleno = 1808 (0x710), region = 40 }
  0x10   : > { %258 = sbr.rel (!%p253_p4) target bundleno = 25 (0x19), region = 44  ;;  %v2644_v0 = vmov (%p253_p4), 0.0  }
  0x11   : > { %259 = vst [vmem:[#allocation2] sm:$0xff] (%p253_p4), %v2644_v0  ;;  %260 = vst [vmem:[#allocation2 + $0x8] sm:$0xff] (%p253_p4), %v2644_v0 }
  0x12   : > { %261 = vst [vmem:[#allocation2 + $0x10] sm:$0xff] (%p253_p4), %v2644_v0  ;;  %262 = vst [vmem:[#allocation2 + $0x18] sm:$0xff] (%p253_p4), %v2644_v0 }
  0x13   : > { %263 = vst [vmem:[#allocation2 + $0x20] sm:$0xff] (%p253_p4), %v2644_v0  ;;  %264 = vst [vmem:[#allocation2 + $0x28] sm:$0xff] (%p253_p4), %v2644_v0 }
  0x14   : > { %265 = vst [vmem:[#allocation2 + $0x30] sm:$0xff] (%p253_p4), %v2644_v0  ;;  %266 = vst [vmem:[#allocation2 + $0x38] sm:$0xff] (%p253_p4), %v2644_v0 }
  0x15   : > { %267 = vst [vmem:[#allocation2 + $0x40] sm:$0xff] (%p253_p4), %v2644_v0  ;;  %268 = vst [vmem:[#allocation2 + $0x48] sm:$0xff] (%p253_p4), %v2644_v0 }
  0x16   : > { %269 = vst [vmem:[#allocation2 + $0x50] sm:$0xff] (%p253_p4), %v2644_v0  ;;  %270 = vst [vmem:[#allocation2 + $0x58] sm:$0xff] (%p253_p4), %v2644_v0 }
  0x17   : > { %271 = vst [vmem:[#allocation2 + $0x60] sm:$0xff] %v2644_v0  ;;  %272 = vst [vmem:[#allocation2 + $0x68] sm:$0xff] %v2644_v0 }
  0x18   : > { %273 = vst [vmem:[#allocation2 + $0x70] sm:$0xff] %v2644_v0  ;;  %274 = vst [vmem:[#allocation2 + $0x78] sm:$0xff] %v2644_v0 }
  0x19 PF: > { %p1926_p5 = scmp.ne.s32.totalorder %s2634_s21, 0 }
  0x1a   : > { %v2382_v1 = vld [vmem:[%s3302_s0] sm:$0xff] (!%p1926_p5)   ;;  %v2383_v2 = vld [vmem:[%s3302_s0 + $0x8] sm:$0xff] (!%p1926_p5)   ;;  %v2384_v3 = vld [vmem:[%s3302_s0 + $0x10] sm:$0xff] (!%p1926_p5)  }
  0x1b   : > { %277 = sbr.rel (%p1926_p5) target bundleno = 376 (0x178), region = 48  ;;  %378 = vxpose.xlu0.c.b16.start [1/8] (!%p1926_p5), %v2382_v1, 128  ;;  %v2390_v4 = vld [vmem:[%s3303_s1] sm:$0xff] (!%p1926_p5)   ;;  %v2391_v5 = vld [vmem:[%s3303_s1 + $0x8] sm:$0xff] (!%p1926_p5)   ;;  %v2385_v6 = vld [vmem:[%s3302_s0 + $0x18] sm:$0xff] (!%p1926_p5)  }
  0x1c   : > { %2074 = vmatprep.subr.bf16.mxu0 (!%p1926_p5), %v2390_v4  ;;  %2290 = vmatprep.subr.bf16.mxu1 (!%p1926_p5), %v2390_v4  ;;  %v2392_v7 = vld [vmem:[%s3303_s1 + $0x10] sm:$0xff] (!%p1926_p5)   ;;  %v2386_v8 = vld [vmem:[%s3302_s0 + $0x20] sm:$0xff] (!%p1926_p5)   ;;  %v2393_v9 = vld [vmem:[%s3303_s1 + $0x18] sm:$0xff] (!%p1926_p5)  }
  0x1d   : > { %2075 = vmatpush3.bf16.msra.mxu0 (!%p1926_p5), %v2390_v4  ;;  %2298 = vmatpush3.bf16.msra.mxu1 (!%p1926_p5), %v2390_v4  ;;  %v2387_v10 = vld [vmem:[%s3302_s0 + $0x28] sm:$0xff] (!%p1926_p5)   ;;  %v2394_v11 = vld [vmem:[%s3303_s1 + $0x20] sm:$0xff] (!%p1926_p5)   ;;  %v2388_v12 = vld [vmem:[%s3302_s0 + $0x30] sm:$0xff] (!%p1926_p5)  }
  0x1e   : > { %2076 = vmatprep.subr.bf16.mxu0 (!%p1926_p5), %v2391_v5  ;;  %2291 = vmatprep.subr.bf16.mxu1 (!%p1926_p5), %v2391_v5  ;;  %v2395_v13 = vld [vmem:[%s3303_s1 + $0x28] sm:$0xff] (!%p1926_p5)   ;;  %v2389_v14 = vld [vmem:[%s3302_s0 + $0x38] sm:$0xff] (!%p1926_p5)   ;;  %v2396_v15 = vld [vmem:[%s3303_s1 + $0x30] sm:$0xff] (!%p1926_p5)  }
  0x1f   : > { %379 = vxpose.xlu0.c.b16.cont [2/8] (!%p1926_p5), %v2383_v2, 128  ;;  %v2397_v16 = vld [vmem:[%s3303_s1 + $0x38] sm:$0xff] (!%p1926_p5)   ;;  %v316_v25 = vld [vmem:[#allocation2 + $0x10] sm:$0xff] (!%p1926_p5)  ;;  %v314_v26 = vld [vmem:[#allocation2] sm:$0xff] (!%p1926_p5) }
  0x20   : > { %v317_v28 = vld [vmem:[#allocation2 + $0x18] sm:$0xff] (!%p1926_p5)  ;;  %v315_v31 = vld [vmem:[#allocation2 + $0x8] sm:$0xff] (!%p1926_p5)  ;;  %v320_v37 = vld [vmem:[#allocation2 + $0x30] sm:$0xff] (!%p1926_p5) }
  0x21   : > { %2077 = vmatpush3.bf16.msra.mxu0 (!%p1926_p5), %v2391_v5  ;;  %2299 = vmatpush3.bf16.msra.mxu1 (!%p1926_p5), %v2391_v5  ;;  %v318_v38 = vld [vmem:[#allocation2 + $0x20] sm:$0xff] (!%p1926_p5)  ;;  %v321_v40 = vld [vmem:[#allocation2 + $0x38] sm:$0xff] (!%p1926_p5)  ;;  %v319_v43 = vld [vmem:[#allocation2 + $0x28] sm:$0xff] (!%p1926_p5) }
  0x22   : > { %2078 = vmatprep.subr.bf16.mxu0 %v2392_v7  ;;  %2292 = vmatprep.subr.bf16.mxu1 %v2392_v7  ;;  %v324_v49 = vld [vmem:[#allocation2 + $0x50] sm:$0xff]  ;;  %v322_v50 = vld [vmem:[#allocation2 + $0x40] sm:$0xff]  ;;  %v325_v52 = vld [vmem:[#allocation2 + $0x58] sm:$0xff] }
  0x23   : > { %380 = vxpose.xlu0.c.b16.cont [3/8] %v2384_v3, 128  ;;  %v323_v55 = vld [vmem:[#allocation2 + $0x48] sm:$0xff]  ;;  %v328_v61 = vld [vmem:[#allocation2 + $0x70] sm:$0xff]  ;;  %v326_v62 = vld [vmem:[#allocation2 + $0x60] sm:$0xff] }
  0x24   : > { %v329_v0 = vld [vmem:[#allocation2 + $0x78] sm:$0xff]  ;;  %v327_v3 = vld [vmem:[#allocation2 + $0x68] sm:$0xff] }
  0x25   : > { %2079 = vmatpush3.bf16.msra.mxu0 %v2392_v7  ;;  %2300 = vmatpush3.bf16.msra.mxu1 %v2392_v7 }
  0x26   : > { %2080 = vmatprep.subr.bf16.mxu0 %v2393_v9  ;;  %2293 = vmatprep.subr.bf16.mxu1 %v2393_v9 }
  0x27   : > { %381 = vxpose.xlu0.c.b16.cont [4/8] %v2385_v6, 128 }
  0x29   : > { %2081 = vmatpush3.bf16.msra.mxu0 %v2393_v9  ;;  %2301 = vmatpush3.bf16.msra.mxu1 %v2393_v9 }
  0x2a   : > { %2082 = vmatprep.subr.bf16.mxu0 %v2394_v11  ;;  %2294 = vmatprep.subr.bf16.mxu1 %v2394_v11 }
  0x2b   : > { %382 = vxpose.xlu0.c.b16.cont [5/8] %v2386_v8, 128 }
  0x2d   : > { %2083 = vmatpush3.bf16.msra.mxu0 %v2394_v11  ;;  %2302 = vmatpush3.bf16.msra.mxu1 %v2394_v11 }
  0x2e   : > { %2084 = vmatprep.subr.bf16.mxu0 %v2395_v13  ;;  %2295 = vmatprep.subr.bf16.mxu1 %v2395_v13 }
  0x2f   : > { %383 = vxpose.xlu0.c.b16.cont [6/8] %v2387_v10, 128 }
  0x31   : > { %2085 = vmatpush3.bf16.msra.mxu0 %v2395_v13  ;;  %2303 = vmatpush3.bf16.msra.mxu1 %v2395_v13 }
  0x32   : > { %2086 = vmatprep.subr.bf16.mxu0 %v2396_v15  ;;  %2296 = vmatprep.subr.bf16.mxu1 %v2396_v15 }
  0x33   : > { %384 = vxpose.xlu0.c.b16.cont [7/8] %v2388_v12, 128 }
  0x35   : > { %2087 = vmatpush3.bf16.msra.mxu0 %v2396_v15  ;;  %2304 = vmatpush3.bf16.msra.mxu1 %v2396_v15 }
  0x36   : > { %2088 = vmatprep.subr.bf16.mxu0 %v2397_v16  ;;  %2297 = vmatprep.subr.bf16.mxu1 %v2397_v16 }
  0x37   : > { %385 = vxpose.xlu0.c.b16.end [8/8] %v2389_v14, 128 }
  0x39   : > { %2089 = vmatpush3.bf16.msra.mxu0 %v2397_v16  ;;  %2305 = vmatpush3.bf16.msra.mxu1 %v2397_v16 }
  0x81   : > { %v386_v17 = vpop.trf.xlu0 }
  0x82   : > { %2090 = vmatprep.mubr.bf16.mxu0 %v386_v17 }
  0x85   : > { %v387_v18 = vpop.trf.xlu0 }
  0x86   : > { %2091 = vmatmul.mubr.bf16.vlgmr.msra.gmra.mrb[0].mxu0 %v387_v18 }
  0x89   : > { %v388_v19 = vpop.trf.xlu0 }
  0x8a   : > { %2094 = vmatprep.mubr.bf16.mxu0 %v388_v19 }
  0x8d   : > { %v389_v20 = vpop.trf.xlu0 }
  0x8e   : > { %2095 = vmatmul.mubr.bf16.gmra.mrb[4].mxu0 %v389_v20 }
  0x91   : > { %v390_v21 = vpop.trf.xlu0 }
  0x92   : > { %2098 = vmatprep.mubr.bf16.mxu1 %v390_v21 }
  0x95   : > { %v391_v22 = vpop.trf.xlu0 }
  0x96   : > { %2099 = vmatmul.mubr.bf16.vlgmr.msra.gmra.mrb[0].mxu1 %v391_v22 }
  0x99   : > { %v392_v23 = vpop.trf.xlu0 }
  0x9a   : > { %2102 = vmatprep.mubr.bf16.mxu1 %v392_v23 }
  0x9d   : > { %v393_v24 = vpop.trf.xlu0 }
  0x9e   : > { %2103 = vmatmul.mubr.bf16.gmra.mrb[4].mxu1 %v393_v24 }
 0x159   : > { %v2092_v27 = vpop.f32.mrb[0].mxu0 }
 0x15a   : > { %v541_v29 = vadd.f32 %v2092_v27, %v316_v25  ;;  %v476_v30 = vpop.f32.mrb[1].mxu0 }
 0x15b   : > { %v539_v32 = vadd.f32 %v476_v30, %v314_v26  ;;  %v2093_v33 = vpop.f32.mrb[2].mxu0 }
 0x15c   : > { %557 = vst [vmem:[#allocation2 + $0x10] sm:$0xff] %v541_v29  ;;  %v542_v34 = vadd.f32 %v2093_v33, %v317_v28  ;;  %v479_v35 = vpop.f32.mrb[3].mxu0 }
 0x15d   : > { %555 = vst [vmem:[#allocation2] sm:$0xff] %v539_v32  ;;  %v540_v36 = vadd.f32 %v479_v35, %v315_v31 }
 0x15e   : > { %558 = vst [vmem:[#allocation2 + $0x18] sm:$0xff] %v542_v34 }
 0x15f   : > { %556 = vst [vmem:[#allocation2 + $0x8] sm:$0xff] %v540_v36 }
 0x161   : > { %v2096_v39 = vpop.f32.mrb[4].mxu0 }
 0x162   : > { %v545_v41 = vadd.f32 %v2096_v39, %v320_v37  ;;  %v492_v42 = vpop.f32.mrb[5].mxu0 }
 0x163   : > { %v543_v44 = vadd.f32 %v492_v42, %v318_v38  ;;  %v2097_v45 = vpop.f32.mrb[6].mxu0 }
 0x164   : > { %561 = vst [vmem:[#allocation2 + $0x30] sm:$0xff] %v545_v41  ;;  %v546_v46 = vadd.f32 %v2097_v45, %v321_v40  ;;  %v495_v47 = vpop.f32.mrb[7].mxu0 }
 0x165   : > { %559 = vst [vmem:[#allocation2 + $0x20] sm:$0xff] %v543_v44  ;;  %v544_v48 = vadd.f32 %v495_v47, %v319_v43 }
 0x166   : > { %562 = vst [vmem:[#allocation2 + $0x38] sm:$0xff] %v546_v46 }
 0x167   : > { %560 = vst [vmem:[#allocation2 + $0x28] sm:$0xff] %v544_v48 }
 0x169   : > { %v2100_v51 = vpop.f32.mrb[0].mxu1 }
 0x16a   : > { %v549_v53 = vadd.f32 %v2100_v51, %v324_v49  ;;  %v508_v54 = vpop.f32.mrb[1].mxu1 }
 0x16b   : > { %v547_v56 = vadd.f32 %v508_v54, %v322_v50  ;;  %v2101_v57 = vpop.f32.mrb[2].mxu1 }
 0x16c   : > { %565 = vst [vmem:[#allocation2 + $0x50] sm:$0xff] %v549_v53  ;;  %v550_v58 = vadd.f32 %v2101_v57, %v325_v52  ;;  %v511_v59 = vpop.f32.mrb[3].mxu1 }
 0x16d   : > { %563 = vst [vmem:[#allocation2 + $0x40] sm:$0xff] %v547_v56  ;;  %v548_v60 = vadd.f32 %v511_v59, %v323_v55 }
 0x16e   : > { %566 = vst [vmem:[#allocation2 + $0x58] sm:$0xff] %v550_v58 }
 0x16f   : > { %564 = vst [vmem:[#allocation2 + $0x48] sm:$0xff] %v548_v60 }
 0x171   : > { %v2104_v63 = vpop.f32.mrb[4].mxu1 }
 0x172   : > { %v553_v1 = vadd.f32 %v2104_v63, %v328_v61  ;;  %v524_v2 = vpop.f32.mrb[5].mxu1 }
 0x173   : > { %v551_v4 = vadd.f32 %v524_v2, %v326_v62  ;;  %v2105_v5 = vpop.f32.mrb[6].mxu1 }
 0x174   : > { %569 = vst [vmem:[#allocation2 + $0x70] sm:$0xff] %v553_v1  ;;  %v554_v6 = vadd.f32 %v2105_v5, %v329_v0  ;;  %v527_v7 = vpop.f32.mrb[7].mxu1 }
 0x175   : > { %567 = vst [vmem:[#allocation2 + $0x60] sm:$0xff] %v551_v4  ;;  %v552_v8 = vadd.f32 %v527_v7, %v327_v3 }
 0x176   : > { %570 = vst [vmem:[#allocation2 + $0x78] sm:$0xff] %v554_v6 }
 0x177   : > { %568 = vst [vmem:[#allocation2 + $0x68] sm:$0xff] %v552_v8 }
 0x178 PF: > { %p571_p6 = scmp.eq.s32.totalorder %s2634_s21, 1 }
 0x179   : > { %v2759_v9 = vld [vmem:[#allocation2 + $0x8] sm:$0xff] (%p571_p6)  ;;  %v2761_v10 = vld [vmem:[#allocation2] sm:$0xff] (%p571_p6)  ;;  %v2645_v12 = vmov (%p571_p6), 0   ;;  %v2771_v18 = vld [vmem:[#allocation2 + $0x50] sm:$0xff] (%p571_p6)  ;;  %vm888_vm0 = vcmask (%p571_p6), 523264   ;;  %s2646_s11 = smov (%p571_p6), 64  }
 0x17a   : > { %575 = sbr.rel (!%p571_p6) target bundleno = 1216 (0x4c0), region = 52  ;;  %v2763_v11 = vld [vmem:[#allocation2 + $0x48] sm:$0xff] (%p571_p6)  ;;  %2399 = vset.pattern.permute.xlu1 (%p571_p6), %v2645_v12  ;;  %2398 = vset.pattern.permute.xlu0 (%p571_p6), %v2645_v12  ;;  %v593_v13 = vmax.f32 (%p571_p6), %v2759_v9, 1.0  ;;  %v592_v14 = vmax.f32 (%p571_p6), %v2761_v10, 1.0  ;;  %v2768_v16 = vld [vmem:[#allocation2 + $0x40] sm:$0xff] (%p571_p6)  ;;  %v2773_v19 = vld [vmem:[#allocation2 + $0x10] sm:$0xff] (%p571_p6) }
 0x17b   : > { %v601_v15 = vmax.f32 (%p571_p6), %v2763_v11, 1.0  ;;  %v600_v17 = vmax.f32 (%p571_p6), %v2768_v16, 1.0  ;;  %v2775_v20 = vld [vmem:[#allocation2 + $0x58] sm:$0xff] (%p571_p6)  ;;  %v602_v21 = vmax.f32 (%p571_p6), %v2771_v18, 1.0  ;;  %v720_v23 = vld [vmem:[%s3304_s2] sm:$0xff] (%p571_p6)  ;;  %v721_v24 = vld [vmem:[%s3304_s2 + $0x8] sm:$0xff] (%p571_p6) }
 0x17c   : > { %2448 = vrcp.f32 (%p571_p6), %v593_v13  ;;  %v2778_v22 = vld [vmem:[#allocation2 + $0x18] sm:$0xff] (%p571_p6)  ;;  %v594_v25 = vmax.f32 (%p571_p6), %v2773_v19, 1.0  ;;  %v2787_v26 = vld [vmem:[#allocation2 + $0x60] sm:$0xff] (%p571_p6)  ;;  %v2258_v27 = vpack.c.bf16 (%p571_p6), %v721_v24, %v720_v23  ;;  %v722_v28 = vld [vmem:[%s3304_s2 + $0x10] sm:$0xff] (%p571_p6)  ;;  %v603_v34 = vmax.f32 (%p571_p6), %v2775_v20, 1.0 }
 0x17d   : > { %2450 = vrcp.f32 (%p571_p6), %v592_v14  ;;  %v723_v29 = vld [vmem:[%s3304_s2 + $0x18] sm:$0xff] (%p571_p6)  ;;  %v2795_v30 = vld [vmem:[#allocation2 + $0x20] sm:$0xff] (%p571_p6)  ;;  %v725_v33 = vld [vmem:[%s3304_s2 + $0x28] sm:$0xff] (%p571_p6)  ;;  %v595_v35 = vmax.f32 (%p571_p6), %v2778_v22, 1.0  ;;  %v604_v36 = vmax.f32 (%p571_p6), %v2787_v26, 1.0 }
 0x17e   : > { %2452 = vrcp.f32 (%p571_p6), %v601_v15  ;;  %v2262_v31 = vpack.c.bf16 (%p571_p6), %v723_v29, %v722_v28  ;;  %v724_v32 = vld [vmem:[%s3304_s2 + $0x20] sm:$0xff] (%p571_p6)  ;;  %2259 = vmatprep.subr.bf16.mxu0 (%p571_p6), %v2258_v27  ;;  %2306 = vmatprep.subr.bf16.mxu1 (%p571_p6), %v2258_v27  ;;  %v596_v37 = vmax.f32 (%p571_p6), %v2795_v30, 1.0  ;;  %v726_v39 = vld [vmem:[%s3304_s2 + $0x30] sm:$0xff] (%p571_p6)  ;;  %v727_v40 = vld [vmem:[%s3304_s2 + $0x38] sm:$0xff] (%p571_p6) }
 0x17f   : > { %2454 = vrcp.f32 (%p571_p6), %v600_v17  ;;  %2261 = vmatpush3.bf16.msra.mxu0 (%p571_p6), %v2258_v27  ;;  %2314 = vmatpush3.bf16.msra.mxu1 (%p571_p6), %v2258_v27  ;;  %v2266_v38 = vpack.c.bf16 (%p571_p6), %v725_v33, %v724_v32  ;;  %v2813_v41 = vld [vmem:[#allocation2 + $0x68] sm:$0xff] (%p571_p6)  ;;  %v728_v44 = vld [vmem:[%s3304_s2 + $0x40] sm:$0xff] (%p571_p6)  ;;  %v2270_v47 = vpack.c.bf16 (%p571_p6), %v727_v40, %v726_v39  ;;  %v2825_v52 = vld [vmem:[#allocation2 + $0x70] sm:$0xff] (%p571_p6) }
 0x180   : > { %2456 = vrcp.f32 (%p571_p6), %v602_v21  ;;  %2263 = vmatprep.subr.bf16.mxu0 (%p571_p6), %v2262_v31  ;;  %2307 = vmatprep.subr.bf16.mxu1 (%p571_p6), %v2262_v31  ;;  %v2815_v43 = vld [vmem:[#allocation2 + $0x28] sm:$0xff] (%p571_p6)  ;;  %v605_v50 = vmax.f32 (%p571_p6), %v2813_v41, 1.0  ;;  %v2827_v55 = vld [vmem:[#allocation2 + $0x30] sm:$0xff] (%p571_p6)  ;;  %v731_v57 = vld [vmem:[%s3304_s2 + $0x58] sm:$0xff] (%p571_p6)  ;;  %v606_v59 = vmax.f32 (%p571_p6), %v2825_v52, 1.0 }
 0x181   : > { %2458 = vrcp.f32 %v594_v25  ;;  %v729_v45 = vld [vmem:[%s3304_s2 + $0x48] sm:$0xff]  ;;  %v597_v51 = vmax.f32 %v2815_v43, 1.0  ;;  %v730_v56 = vld [vmem:[%s3304_s2 + $0x50] sm:$0xff]  ;;  %v598_v60 = vmax.f32 %v2827_v55, 1.0  ;;  %v2837_v61 = vld [vmem:[#allocation2 + $0x78] sm:$0xff] }
 0x182   : > { %2460 = vrcp.f32 %v603_v34  ;;  %v2274_v53 = vpack.c.bf16 %v729_v45, %v728_v44  ;;  %v2278_v62 = vpack.c.bf16 %v731_v57, %v730_v56  ;;  %v2839_v0 = vld [vmem:[#allocation2 + $0x38] sm:$0xff]  ;;  %v732_v1 = vld [vmem:[%s3304_s2 + $0x60] sm:$0xff]  ;;  %v733_v2 = vld [vmem:[%s3304_s2 + $0x68] sm:$0xff]  ;;  %v607_v4 = vmax.f32 %v2837_v61, 1.0 }
 0x183   : > { %2265 = vmatpush3.bf16.msra.mxu0 %v2262_v31  ;;  %2315 = vmatpush3.bf16.msra.mxu1 %v2262_v31  ;;  %2462 = vrcp.f32 %v595_v35  ;;  %v599_v5 = vmax.f32 %v2839_v0, 1.0  ;;  %v2282_v6 = vpack.c.bf16 %v733_v2, %v732_v1  ;;  %v734_v8 = vld [vmem:[%s3304_s2 + $0x70] sm:$0xff]  ;;  %v735_v12 = vld [vmem:[%s3304_s2 + $0x78] sm:$0xff] }
 0x184   : > { %2267 = vmatprep.subr.bf16.mxu0 %v2266_v38  ;;  %2308 = vmatprep.subr.bf16.mxu1 %v2266_v38  ;;  %2464 = vrcp.f32 %v604_v36  ;;  %v2286_v14 = vpack.c.bf16 %v735_v12, %v734_v8 }
 0x185   : > { %2466 = vrcp.f32 %v596_v37 }
 0x186   : > { %v2449_v42 = vpop.eup %2448  ;;  %2468 = vrcp.f32 %v605_v50 }
 0x187   : > { %v2451_v46 = vpop.eup %2450  ;;  %631 = vperm.xlu1 %2399, %v2449_v42   ;;  %2269 = vmatpush3.bf16.msra.mxu0 %v2266_v38  ;;  %2470 = vrcp.f32 %v597_v51 }
 0x188   : > { %v2453_v48 = vpop.eup %2452  ;;  %626 = vperm.xlu0 %2398, %v2451_v46   ;;  %2316 = vmatpush3.bf16.msra.mxu1 %v2266_v38  ;;  %2472 = vrcp.f32 %v606_v59 }
 0x189   : > { %v2455_v49 = vpop.eup %2454  ;;  %2271 = vmatprep.subr.bf16.mxu0 %v2270_v47  ;;  %2309 = vmatprep.subr.bf16.mxu1 %v2270_v47  ;;  %2474 = vrcp.f32 %v598_v60 }
 0x18a   : > { %v2457_v54 = vpop.eup %2456  ;;  %2476 = vrcp.f32 %v607_v4 }
 0x18b   : > { %671 = vperm.xlu1 %2399, %v2453_v48   ;;  %v2459_v58 = vpop.eup %2458  ;;  %2273 = vmatpush3.bf16.msra.mxu0 %v2270_v47  ;;  %2478 = vrcp.f32 %v599_v5 }
 0x18c   : > { %666 = vperm.xlu0 %2398, %v2455_v49   ;;  %2317 = vmatpush3.bf16.msra.mxu1 %v2270_v47  ;;  %v2461_v63 = vpop.eup %2460 }
 0x18d   : > { %2275 = vmatprep.subr.bf16.mxu0 %v2274_v53  ;;  %2310 = vmatprep.subr.bf16.mxu1 %v2274_v53  ;;  %v2463_v3 = vpop.eup %2462 }
 0x18e   : > { %v2465_v7 = vpop.eup %2464 }
 0x18f   : > { %676 = vperm.xlu1 %2399, %v2457_v54   ;;  %2277 = vmatpush3.bf16.msra.mxu0 %v2274_v53  ;;  %v2467_v13 = vpop.eup %2466 }
 0x190   : > { %636 = vperm.xlu0 %2398, %v2459_v58   ;;  %2318 = vmatpush3.bf16.msra.mxu1 %v2274_v53  ;;  %v2469_v15 = vpop.eup %2468 }
 0x191   : > { %2279 = vmatprep.subr.bf16.mxu0 %v2278_v62  ;;  %2311 = vmatprep.subr.bf16.mxu1 %v2278_v62  ;;  %v2471_v17 = vpop.eup %2470 }
 0x192   : > { %v2473_v21 = vpop.eup %2472 }
 0x193   : > { %681 = vperm.xlu1 %2399, %v2461_v63   ;;  %2281 = vmatpush3.bf16.msra.mxu0 %v2278_v62  ;;  %v2475_v23 = vpop.eup %2474 }
 0x194   : > { %641 = vperm.xlu0 %2398, %v2463_v3   ;;  %2319 = vmatpush3.bf16.msra.mxu1 %v2278_v62  ;;  %v2477_v24 = vpop.eup %2476 }
 0x195   : > { %2283 = vmatprep.subr.bf16.mxu0 %v2282_v6  ;;  %2312 = vmatprep.subr.bf16.mxu1 %v2282_v6  ;;  %v2479_v25 = vpop.eup %2478 }
 0x197   : > { %686 = vperm.xlu1 %2399, %v2465_v7   ;;  %2285 = vmatpush3.bf16.msra.mxu0 %v2282_v6 }
 0x198   : > { %646 = vperm.xlu0 %2398, %v2467_v13   ;;  %2320 = vmatpush3.bf16.msra.mxu1 %v2282_v6 }
 0x199   : > { %2287 = vmatprep.subr.bf16.mxu0 %v2286_v14  ;;  %2313 = vmatprep.subr.bf16.mxu1 %v2286_v14 }
 0x19b   : > { %691 = vperm.xlu1 %2399, %v2469_v15   ;;  %2289 = vmatpush3.bf16.msra.mxu0 %v2286_v14 }
 0x19c   : > { %651 = vperm.xlu0 %2398, %v2471_v17   ;;  %2321 = vmatpush3.bf16.msra.mxu1 %v2286_v14 }
 0x19f   : > { %696 = vperm.xlu1 %2399, %v2473_v21  }
 0x1a0   : > { %656 = vperm.xlu0 %2398, %v2475_v23  }
 0x1a3   : > { %701 = vperm.xlu1 %2399, %v2477_v24  }
 0x1a4   : > { %661 = vperm.xlu0 %2398, %v2479_v25  }
 0x206   : > { %v632_v27 = vpop.permute.xlu1 %631 }
 0x207   : > { %v705_v28 = vmul.f32 %v632_v27, %v2759_v9  ;;  %v627_v29 = vpop.permute.xlu0 %626 }
 0x208   : > { %v704_v31 = vmul.f32 %v627_v29, %v2761_v10 }
 0x20a   : > { %2138 = vmatprep.mubr.f32.mxu0 %v704_v31  ;;  %v672_v32 = vpop.permute.xlu1 %671 }
 0x20b   : > { %v713_v33 = vmul.f32 %v672_v32, %v2763_v11  ;;  %2139 = vmatmul.mubr.f32.vlgmr.msra.gmra.mrb[0].mxu0 %v705_v28  ;;  %v667_v34 = vpop.permute.xlu0 %666 }
 0x20c   : > { %v712_v35 = vmul.f32 %v667_v34, %v2768_v16 }
 0x20e   : > { %2150 = vmatprep.mubr.f32.mxu1 %v712_v35  ;;  %v677_v36 = vpop.permute.xlu1 %676 }
 0x20f   : > { %v714_v37 = vmul.f32 %v677_v36, %v2771_v18  ;;  %2151 = vmatmul.mubr.f32.vlgmr.msra.gmra.mrb[0].mxu1 %v713_v33  ;;  %v637_v38 = vpop.permute.xlu0 %636 }
 0x210   : > { %v706_v39 = vmul.f32 %v637_v38, %v2773_v19 }
 0x211   : > { %2153 = vmatprep.mubr.f32.mxu1 %v714_v37 }
 0x212   : > { %2141 = vmatprep.mubr.f32.mxu0 %v706_v39  ;;  %v682_v9 = vpop.permute.xlu1 %681 }
 0x213   : > { %v715_v10 = vmul.f32 %v682_v9, %v2775_v20  ;;  %v642_v40 = vpop.permute.xlu0 %641 }
 0x214   : > { %v707_v11 = vmul.f32 %v642_v40, %v2778_v22 }
 0x215   : > { %2154 = vmatmul.mubr.f32.gmra.mrb[2].mxu1 %v715_v10 }
 0x216   : > { %2142 = vmatmul.mubr.f32.gmra.mrb[2].mxu0 %v707_v11  ;;  %v687_v42 = vpop.permute.xlu1 %686 }
 0x217   : > { %v716_v16 = vmul.f32 %v687_v42, %v2787_v26  ;;  %v647_v44 = vpop.permute.xlu0 %646 }
 0x218   : > { %v708_v18 = vmul.f32 %v647_v44, %v2795_v30 }
 0x219   : > { %2156 = vmatprep.mubr.f32.mxu1 %v716_v16 }
 0x21a   : > { %2144 = vmatprep.mubr.f32.mxu0 %v708_v18  ;;  %v692_v45 = vpop.permute.xlu1 %691 }
 0x21b   : > { %v717_v19 = vmul.f32 %v692_v45, %v2813_v41  ;;  %v652_v46 = vpop.permute.xlu0 %651  ;;  %v1944_v41 = vld [vmem:[%s3305_s3] ss:$0 sm:$0xff] }
 0x21c   : > { %v709_v47 = vmul.f32 %v652_v46, %v2815_v43 }
 0x21d   : > { %2157 = vmatmul.mubr.f32.gmra.mrb[4].mxu1 %v717_v19 }
 0x21e   : > { %2145 = vmatmul.mubr.f32.gmra.mrb[4].mxu0 %v709_v47  ;;  %v697_v20 = vpop.permute.xlu1 %696 }
 0x21f   : > { %v718_v22 = vmul.f32 %v697_v20, %v2825_v52  ;;  %v657_v48 = vpop.permute.xlu0 %656 }
 0x220   : > { %v710_v49 = vmul.f32 %v657_v48, %v2827_v55 }
 0x221   : > { %2159 = vmatprep.mubr.f32.mxu1 %v718_v22 }
 0x222   : > { %2147 = vmatprep.mubr.f32.mxu0 %v710_v49  ;;  %v702_v26 = vpop.permute.xlu1 %701 }
 0x223   : > { %v719_v30 = vmul.f32 %v702_v26, %v2837_v61  ;;  %v662_v50 = vpop.permute.xlu0 %661 }
 0x224   : > { %v711_v51 = vmul.f32 %v662_v50, %v2839_v0 }
 0x225   : > { %2160 = vmatmul.mubr.f32.gmra.mrb[6].mxu1 %v719_v30 }
 0x226   : > { %2148 = vmatmul.mubr.f32.gmra.mrb[6].mxu0 %v711_v51 }
 0x2de   : > { %v2140_v43 = vpop.f32.mrb[0].mxu0 }
 0x2df   : > { %v2874_v52 = vadd.f32 %v2140_v43, %v1944_v41  ;;  %v809_v53 = vpop.f32.mrb[1].mxu0 }
 0x2e0   : > { %v2882_v59 = vadd.f32 %v1944_v41, %v809_v53 }
 0x2e1   : > { %v892_v54 = vsel %vm888_vm0, %v2874_v52, -inf }
 0x2e2   : > { %893 = vmax.xlane.f32.xlu1 %v892_v54  ;;  %v2152_v55 = vpop.f32.mrb[0].mxu1  ;;  %v889_v0 = vsel %vm888_vm0, %v2882_v59, -inf }
 0x2e3   : > { %v2878_v56 = vadd.f32 %v2152_v55, %v1944_v41  ;;  %v849_v57 = vpop.f32.mrb[1].mxu1 }
 0x2e4   : > { %v2880_v58 = vadd.f32 %v1944_v41, %v849_v57 }
 0x2e5   : > { %v916_v60 = vsel %vm888_vm0, %v2878_v56, -inf }
 0x2e6   : > { %917 = vmax.xlane.f32.xlu0 %v916_v60  ;;  %v913_v61 = vsel %vm888_vm0, %v2880_v58, -inf }
 0x2e7   : > { %914 = vmax.xlane.f32.xlu1 %v913_v61 }
 0x2e8   : > { %v2155_v62 = vpop.f32.mrb[2].mxu1 }
 0x2e9   : > { %v2143_v63 = vpop.f32.mrb[2].mxu0  ;;  %v859_v1 = vpop.f32.mrb[3].mxu1  ;;  %v2898_v7 = vadd.f32 %v2155_v62, %v1944_v41 }
 0x2ea   : > { %v2890_v2 = vadd.f32 %v2143_v63, %v1944_v41  ;;  %890 = vmax.xlane.f32.xlu0 %v889_v0  ;;  %v819_v3 = vpop.f32.mrb[3].mxu0  ;;  %v2892_v4 = vadd.f32 %v1944_v41, %v859_v1 }
 0x2eb   : > { %v2900_v12 = vadd.f32 %v1944_v41, %v819_v3  ;;  %v922_v15 = vsel %vm888_vm0, %v2898_v7, -inf }
 0x2ec   : > { %v919_v5 = vsel %vm888_vm0, %v2892_v4, -inf  ;;  %v898_v6 = vsel %vm888_vm0, %v2890_v2, -inf }
 0x2ed   : > { %920 = vmax.xlane.f32.xlu1 %v919_v5  ;;  %v895_v25 = vsel %vm888_vm0, %v2900_v12, -inf }
 0x2ee   : > { %899 = vmax.xlane.f32.xlu0 %v898_v6 }
 0x2f0   : > { %v2158_v8 = vpop.f32.mrb[4].mxu1 }
 0x2f1   : > { %v2146_v13 = vpop.f32.mrb[4].mxu0  ;;  %v869_v14 = vpop.f32.mrb[5].mxu1  ;;  %v2914_v29 = vadd.f32 %v2158_v8, %v1944_v41 }
 0x2f2   : > { %923 = vmax.xlane.f32.xlu0 %v922_v15  ;;  %v829_v17 = vpop.f32.mrb[5].mxu0  ;;  %v2906_v23 = vadd.f32 %v2146_v13, %v1944_v41  ;;  %v2908_v24 = vadd.f32 %v1944_v41, %v869_v14 }
 0x2f3   : > { %v2904_v21 = vadd.f32 %v1944_v41, %v829_v17  ;;  %v928_v39 = vsel %vm888_vm0, %v2914_v29, -inf }
 0x2f4   : > { %v904_v33 = vsel %vm888_vm0, %v2906_v23, -inf  ;;  %v925_v34 = vsel %vm888_vm0, %v2908_v24, -inf }
 0x2f5   : > { %v901_v27 = vsel %vm888_vm0, %v2904_v21, -inf }
 0x2f6   : > { %896 = vmax.xlane.f32.xlu0 %v895_v25  ;;  %902 = vmax.xlane.f32.xlu1 %v901_v27 }
 0x2f8   : > { %v2161_v28 = vpop.f32.mrb[6].mxu1 }
 0x2f9   : > { %v2149_v31 = vpop.f32.mrb[6].mxu0  ;;  %v879_v32 = vpop.f32.mrb[7].mxu1  ;;  %v2930_v10 = vadd.f32 %v2161_v28, %v1944_v41 }
 0x2fa   : > { %905 = vmax.xlane.f32.xlu0 %v904_v33  ;;  %926 = vmax.xlane.f32.xlu1 %v925_v34  ;;  %v839_v35 = vpop.f32.mrb[7].mxu0  ;;  %v2922_v37 = vadd.f32 %v2149_v31, %v1944_v41  ;;  %v2924_v38 = vadd.f32 %v1944_v41, %v879_v32 }
 0x2fb   : > { %v2920_v36 = vadd.f32 %v1944_v41, %v839_v35  ;;  %v934_v42 = vsel %vm888_vm0, %v2930_v10, -inf }
 0x2fc   : > { %v910_v40 = vsel %vm888_vm0, %v2922_v37, -inf  ;;  %v931_v11 = vsel %vm888_vm0, %v2924_v38, -inf }
 0x2fd   : > { %v907_v9 = vsel %vm888_vm0, %v2920_v36, -inf }
 0x2fe   : > { %929 = vmax.xlane.f32.xlu0 %v928_v39  ;;  %908 = vmax.xlane.f32.xlu1 %v907_v9 }
 0x302   : > { %911 = vmax.xlane.f32.xlu0 %v910_v40  ;;  %932 = vmax.xlane.f32.xlu1 %v931_v11 }
 0x306   : > { %935 = vmax.xlane.f32.xlu0 %v934_v42 }
 0x36f   : > { %v894_v16 = vpop.xlane.xlu1 %893 }
 0x370   : > { %v938_v44 = vsub.f32 %v2874_v52, %v894_v16 }
 0x372   : > { %v955_v18 = vmul.f32 1.442695, %v938_v44 }
 0x373   : > { %v918_v45 = vpop.xlane.xlu0 %917 }
 0x374   : > { %2480 = vpow2.f32 %v955_v18  ;;  %v946_v19 = vsub.f32 %v2878_v56, %v918_v45  ;;  %v915_v46 = vpop.xlane.xlu1 %914 }
 0x375   : > { %v945_v20 = vsub.f32 %v2880_v58, %v915_v46 }
 0x376   : > { %v971_v47 = vmul.f32 1.442695, %v946_v19 }
 0x377   : > { %v891_v22 = vpop.xlane.xlu0 %890  ;;  %v969_v49 = vmul.f32 1.442695, %v945_v20 }
 0x378   : > { %2482 = vpow2.f32 %v971_v47  ;;  %v937_v48 = vsub.f32 %v2882_v59, %v891_v22 }
 0x37a   : > { %v953_v26 = vmul.f32 1.442695, %v937_v48  ;;  %v921_v43 = vpop.xlane.xlu1 %920 }
 0x37b   : > { %v900_v30 = vpop.xlane.xlu0 %899  ;;  %v947_v56 = vsub.f32 %v2892_v4, %v921_v43 }
 0x37c   : > { %2484 = vpow2.f32 %v953_v26  ;;  %v940_v50 = vsub.f32 %v2890_v2, %v900_v30 }
 0x37d   : > { %2486 = vpow2.f32 %v969_v49  ;;  %v973_v63 = vmul.f32 1.442695, %v947_v56 }
 0x37e   : > { %v2943_v51 = vpop.eup %2480  ;;  %v959_v41 = vmul.f32 1.442695, %v940_v50 }
 0x37f   : > { %v924_v52 = vpop.xlane.xlu0 %923  ;;  %v988_v53 = vsel %vm888_vm0, %v2943_v51, 0.0 }
 0x380   : > { %2488 = vpow2.f32 %v959_v41  ;;  %v948_v54 = vsub.f32 %v2898_v7, %v924_v52  ;;  %989 = vadd.xlane.f32.xlu0 %v988_v53 }
 0x382   : > { %v2948_v55 = vpop.eup %2482  ;;  %v975_v57 = vmul.f32 1.442695, %v948_v54 }
 0x383   : > { %v903_v58 = vpop.xlane.xlu1 %902  ;;  %v897_v59 = vpop.xlane.xlu0 %896  ;;  %v1012_v60 = vsel %vm888_vm0, %v2948_v55, 0.0 }
 0x384   : > { %2490 = vpow2.f32 %v975_v57  ;;  %v939_v61 = vsub.f32 %v2900_v12, %v897_v59  ;;  %1013 = vadd.xlane.f32.xlu0 %v1012_v60  ;;  %v941_v1 = vsub.f32 %v2904_v21, %v903_v58 }
 0x386   : > { %v2954_v62 = vpop.eup %2484  ;;  %v957_v0 = vmul.f32 1.442695, %v939_v61  ;;  %v961_v12 = vmul.f32 1.442695, %v941_v1 }
 0x387   : > { %v927_v2 = vpop.xlane.xlu1 %926  ;;  %v906_v3 = vpop.xlane.xlu0 %905  ;;  %v985_v4 = vsel %vm888_vm0, %v2954_v62, 0.0 }
 0x388   : > { %v2959_v5 = vpop.eup %2486  ;;  %v942_v6 = vsub.f32 %v2906_v23, %v906_v3  ;;  %986 = vadd.xlane.f32.xlu1 %v985_v4  ;;  %2492 = vpow2.f32 %v957_v0  ;;  %v949_v13 = vsub.f32 %v2908_v24, %v927_v2 }
 0x389   : > { %2494 = vpow2.f32 %v973_v63  ;;  %v1009_v17 = vsel %vm888_vm0, %v2959_v5, 0.0 }
 0x38a   : > { %v2962_v7 = vpop.eup %2488  ;;  %v963_v8 = vmul.f32 1.442695, %v942_v6  ;;  %v977_v28 = vmul.f32 1.442695, %v949_v13 }
 0x38b   : > { %v909_v14 = vpop.xlane.xlu1 %908  ;;  %v930_v15 = vpop.xlane.xlu0 %929  ;;  %v994_v21 = vsel %vm888_vm0, %v2962_v7, 0.0 }
 0x38c   : > { %v950_v25 = vsub.f32 %v2914_v29, %v930_v15  ;;  %1010 = vadd.xlane.f32.xlu1 %v1009_v17  ;;  %995 = vadd.xlane.f32.xlu0 %v994_v21  ;;  %2496 = vpow2.f32 %v963_v8  ;;  %v943_v24 = vsub.f32 %v2920_v36, %v909_v14 }
 0x38d   : > { %2498 = vpow2.f32 %v961_v12 }
 0x38e   : > { %v2970_v23 = vpop.eup %2490  ;;  %v979_v27 = vmul.f32 1.442695, %v950_v25  ;;  %v965_v39 = vmul.f32 1.442695, %v943_v24 }
 0x38f   : > { %v912_v31 = vpop.xlane.xlu0 %911  ;;  %v1018_v32 = vsel %vm888_vm0, %v2970_v23, 0.0  ;;  %v933_v33 = vpop.xlane.xlu1 %932 }
 0x390   : > { %v944_v34 = vsub.f32 %v2922_v37, %v912_v31  ;;  %1019 = vadd.xlane.f32.xlu0 %v1018_v32  ;;  %2500 = vpow2.f32 %v979_v27  ;;  %v951_v9 = vsub.f32 %v2924_v38, %v933_v33 }
 0x391   : > { %2502 = vpow2.f32 %v977_v28 }
 0x392   : > { %v967_v29 = vmul.f32 1.442695, %v944_v34  ;;  %v2976_v35 = vpop.eup %2492  ;;  %v981_v44 = vmul.f32 1.442695, %v951_v9 }
 0x393   : > { %v936_v40 = vpop.xlane.xlu0 %935  ;;  %v2979_v11 = vpop.eup %2494  ;;  %v991_v42 = vsel %vm888_vm0, %v2976_v35, 0.0 }
 0x394   : > { %v952_v36 = vsub.f32 %v2930_v10, %v936_v40  ;;  %2504 = vpow2.f32 %v967_v29  ;;  %992 = vadd.xlane.f32.xlu1 %v991_v42  ;;  %v1015_v18 = vsel %vm888_vm0, %v2979_v11, 0.0 }
 0x395   : > { %2506 = vpow2.f32 %v965_v39 }
 0x396   : > { %v983_v37 = vmul.f32 1.442695, %v952_v36  ;;  %v2984_v16 = vpop.eup %2496 }
 0x397   : > { %v1000_v38 = vsel %vm888_vm0, %v2984_v16, 0.0  ;;  %v2990_v45 = vpop.eup %2498 }
 0x398   : > { %2508 = vpow2.f32 %v983_v37  ;;  %1016 = vadd.xlane.f32.xlu1 %v1015_v18  ;;  %1001 = vadd.xlane.f32.xlu0 %v1000_v38  ;;  %v997_v19 = vsel %vm888_vm0, %v2990_v45, 0.0 }
 0x399   : > { %2510 = vpow2.f32 %v981_v44 }
 0x39a   : > { %v2992_v10 = vpop.eup %2500 }
 0x39b   : > { %v1024_v46 = vsel %vm888_vm0, %v2992_v10, 0.0  ;;  %v2998_v47 = vpop.eup %2502 }
 0x39c   : > { %998 = vadd.xlane.f32.xlu1 %v997_v19  ;;  %1025 = vadd.xlane.f32.xlu0 %v1024_v46  ;;  %v1021_v22 = vsel %vm888_vm0, %v2998_v47, 0.0 }
 0x39e   : > { %v3000_v20 = vpop.eup %2504 }
 0x39f   : > { %v1006_v48 = vsel %vm888_vm0, %v3000_v20, 0.0  ;;  %v3006_v49 = vpop.eup %2506 }
 0x3a0   : > { %1022 = vadd.xlane.f32.xlu1 %v1021_v22  ;;  %1007 = vadd.xlane.f32.xlu0 %v1006_v48  ;;  %v1003_v50 = vsel %vm888_vm0, %v3006_v49, 0.0 }
 0x3a2   : > { %v3008_v26 = vpop.eup %2508 }
 0x3a3   : > { %v1030_v30 = vsel %vm888_vm0, %v3008_v26, 0.0  ;;  %v3014_v41 = vpop.eup %2510 }
 0x3a4   : > { %1004 = vadd.xlane.f32.xlu1 %v1003_v50  ;;  %1031 = vadd.xlane.f32.xlu0 %v1030_v30  ;;  %v1027_v43 = vsel %vm888_vm0, %v3014_v41, 0.0  ;;  %v2440_v50 = vld [vmem:[%s3306_s4] sm:$0xff]  }
 0x3a8   : > { %1028 = vadd.xlane.f32.xlu1 %v1027_v43 }
 0x40d   : > { %v990_v52 = vpop.xlane.xlu0 %989 }
 0x40e   : > { %2512 = vrcp.f32 %v990_v52 }
 0x411   : > { %v1014_v53 = vpop.xlane.xlu0 %1013 }
 0x415   : > { %v987_v54 = vpop.xlane.xlu1 %986 }
 0x416   : > { %2514 = vrcp.f32 %v987_v54 }
 0x417   : > { %2516 = vrcp.f32 %v1014_v53 }
 0x418   : > { %v2513_v58 = vpop.eup %2512 }
 0x419   : > { %v1011_v56 = vpop.xlane.xlu1 %1010  ;;  %v996_v57 = vpop.xlane.xlu0 %995  ;;  %v3022_v61 = vmul.f32 %v2513_v58, %v2943_v51 }
 0x41a   : > { %2518 = vrcp.f32 %v1011_v56 }
 0x41b   : > { %2520 = vrcp.f32 %v996_v57  ;;  %v2441_v57 = vld [vmem:[%s3306_s4 + $0x20] sm:$0xff]  }
 0x41d   : > { %v1020_v0 = vpop.xlane.xlu0 %1019 }
 0x420   : > { %v2515_v59 = vpop.eup %2514 }
 0x421   : > { %v3019_v60 = vmul.f32 %v2515_v59, %v2954_v62  ;;  %v2517_v63 = vpop.eup %2516  ;;  %v993_v1 = vpop.xlane.xlu1 %992 }
 0x422   : > { %2522 = vrcp.f32 %v993_v1  ;;  %v3031_v62 = vmul.f32 %v2517_v63, %v2948_v55 }
 0x423   : > { %v2400_v2 = vpack.i.bf16 %v3022_v61, %v3019_v60  ;;  %2524 = vrcp.f32 %v1020_v0 }
 0x424   : > { %v2519_v3 = vpop.eup %2518 }
 0x425   : > { %2401 = vrot.lane.b32.xlu1 %v2400_v2, %s2646_s11  ;;  %v3028_v4 = vmul.f32 %v2519_v3, %v2959_v5  ;;  %v1017_v51 = vpop.xlane.xlu1 %1016  ;;  %v1002_v6 = vpop.xlane.xlu0 %1001  ;;  %v2442_v2 = vld [vmem:[%s3306_s4 + $0x8] sm:$0xff]  }
 0x426   : > { %2526 = vrcp.f32 %v1017_v51  ;;  %v2521_v14 = vpop.eup %2520 }
 0x427   : > { %v2405_v8 = vpack.i.bf16 %v3031_v62, %v3028_v4  ;;  %2528 = vrcp.f32 %v1002_v6  ;;  %v3040_v21 = vmul.f32 %v2521_v14, %v2962_v7 }
 0x429   : > { %2406 = vrot.lane.b32.xlu0 %v2405_v8, %s2646_s11  ;;  %v999_v12 = vpop.xlane.xlu1 %998  ;;  %v1026_v13 = vpop.xlane.xlu0 %1025 }
 0x42a   : > { %2530 = vrcp.f32 %v999_v12 }
 0x42b   : > { %2532 = vrcp.f32 %v1026_v13  ;;  %v2443_v13 = vld [vmem:[%s3306_s4 + $0x28] sm:$0xff]  }
 0x42c   : > { %v2523_v15 = vpop.eup %2522 }
 0x42d   : > { %v1023_v5 = vpop.xlane.xlu1 %1022  ;;  %v1008_v17 = vpop.xlane.xlu0 %1007  ;;  %v3037_v55 = vmul.f32 %v2523_v15, %v2976_v35 }
 0x42e   : > { %v2525_v25 = vpop.eup %2524  ;;  %2534 = vrcp.f32 %v1023_v5 }
 0x42f   : > { %v2410_v27 = vpack.i.bf16 %v3040_v21, %v3037_v55  ;;  %2536 = vrcp.f32 %v1008_v17  ;;  %v3049_v33 = vmul.f32 %v2525_v25, %v2970_v23 }
 0x430   : > { %v2527_v28 = vpop.eup %2526 }
 0x431   : > { %v1005_v24 = vpop.xlane.xlu1 %1004  ;;  %2411 = vrot.lane.b32.xlu0 %v2410_v27, %s2646_s11  ;;  %v1032_v31 = vpop.xlane.xlu0 %1031  ;;  %v3046_v32 = vmul.f32 %v2527_v28, %v2979_v11  ;;  %v2444_v27 = vld [vmem:[%s3306_s4 + $0x10] sm:$0xff]  }
 0x432   : > { %v2529_v34 = vpop.eup %2528  ;;  %2538 = vrcp.f32 %v1005_v24 }
 0x433   : > { %v2415_v7 = vpack.i.bf16 %v3049_v33, %v3046_v32  ;;  %2540 = vrcp.f32 %v1032_v31  ;;  %v3058_v9 = vmul.f32 %v2529_v34, %v2984_v16 }
 0x434   : > { %v2531_v29 = vpop.eup %2530 }
 0x435   : > { %v1029_v35 = vpop.xlane.xlu1 %1028  ;;  %2416 = vrot.lane.b32.xlu1 %v2415_v7, %s2646_s11  ;;  %v3055_v39 = vmul.f32 %v2531_v29, %v2990_v45  ;;  %v2533_v40 = vpop.eup %2532  ;;  %v2445_v29 = vld [vmem:[%s3306_s4 + $0x30] sm:$0xff]  }
 0x436   : > { %2542 = vrcp.f32 %v1029_v35  ;;  %v3067_v42 = vmul.f32 %v2533_v40, %v2992_v10  ;;  %v2647_v10 = vmov 0.0  }
 0x437   : > { %v2420_v23 = vpack.i.bf16 %v3058_v9, %v3055_v39  ;;  %1233 = vst [vmem:[#allocation4] sm:$0xff] %v2647_v10  ;;  %1234 = vst [vmem:[#allocation4 + $0x8] sm:$0xff] %v2647_v10 }
 0x438   : > { %v2535_v11 = vpop.eup %2534  ;;  %1235 = vst [vmem:[#allocation4 + $0x10] sm:$0xff] %v2647_v10  ;;  %1236 = vst [vmem:[#allocation4 + $0x18] sm:$0xff] %v2647_v10 }
 0x439   : > { %2421 = vrot.lane.b32.xlu1 %v2420_v23, %s2646_s11  ;;  %v3064_v36 = vmul.f32 %v2535_v11, %v2998_v47  ;;  %v2537_v37 = vpop.eup %2536  ;;  %1237 = vst [vmem:[#allocation4 + $0x20] sm:$0xff] %v2647_v10  ;;  %1238 = vst [vmem:[#allocation4 + $0x28] sm:$0xff] %v2647_v10 }
 0x43a   : > { %v3076_v38 = vmul.f32 %v2537_v37, %v3000_v20  ;;  %1239 = vst [vmem:[#allocation4 + $0x30] sm:$0xff] %v2647_v10  ;;  %1240 = vst [vmem:[#allocation4 + $0x38] sm:$0xff] %v2647_v10 }
 0x43b   : > { %v2430_v44 = vpack.i.bf16 %v3067_v42, %v3064_v36  ;;  %1241 = vst [vmem:[#allocation4 + $0x40] sm:$0xff] %v2647_v10  ;;  %1242 = vst [vmem:[#allocation4 + $0x48] sm:$0xff] %v2647_v10 }
 0x43c   : > { %v2539_v16 = vpop.eup %2538  ;;  %1243 = vst [vmem:[#allocation4 + $0x50] sm:$0xff] %v2647_v10  ;;  %1244 = vst [vmem:[#allocation4 + $0x58] sm:$0xff] %v2647_v10 }
 0x43d   : > { %2431 = vrot.lane.b32.xlu0 %v2430_v44, %s2646_s11  ;;  %v3073_v18 = vmul.f32 %v2539_v16, %v3006_v49  ;;  %v2541_v45 = vpop.eup %2540  ;;  %1245 = vst [vmem:[#allocation4 + $0x60] sm:$0xff] %v2647_v10  ;;  %1246 = vst [vmem:[#allocation4 + $0x68] sm:$0xff] %v2647_v10  ;;  %v2446_v44 = vld [vmem:[%s3306_s4 + $0x18] sm:$0xff]  }
 0x43e   : > { %1247 = vst [vmem:[#allocation4 + $0x70] sm:$0xff] %v2647_v10  ;;  %1248 = vst [vmem:[#allocation4 + $0x78] sm:$0xff] %v2647_v10  ;;  %v3085_v20 = vmul.f32 %v2541_v45, %v3008_v26 }
 0x43f   : > { %v2425_v19 = vpack.i.bf16 %v3076_v38, %v3073_v18  ;;  %1249 = vst [vmem:[#allocation6] sm:$0xff] %v2647_v10  ;;  %1250 = vst [vmem:[#allocation6 + $0x8] sm:$0xff] %v2647_v10 }
 0x440   : > { %v2543_v46 = vpop.eup %2542  ;;  %1251 = vst [vmem:[#allocation6 + $0x10] sm:$0xff] %v2647_v10  ;;  %1252 = vst [vmem:[#allocation6 + $0x18] sm:$0xff] %v2647_v10 }
 0x441   : > { %1253 = vst [vmem:[#allocation6 + $0x20] sm:$0xff] %v2647_v10  ;;  %1254 = vst [vmem:[#allocation6 + $0x28] sm:$0xff] %v2647_v10  ;;  %2426 = vrot.lane.b32.xlu1 %v2425_v19, %s2646_s11  ;;  %v3082_v47 = vmul.f32 %v2543_v46, %v3014_v41 }
 0x442   : > { %1255 = vst [vmem:[#allocation6 + $0x30] sm:$0xff] %v2647_v10  ;;  %1256 = vst [vmem:[#allocation6 + $0x38] sm:$0xff] %v2647_v10 }
 0x443   : > { %1257 = vst [vmem:[#allocation6 + $0x40] sm:$0xff] %v2647_v10  ;;  %1258 = vst [vmem:[#allocation6 + $0x48] sm:$0xff] %v2647_v10  ;;  %v2435_v22 = vpack.i.bf16 %v3085_v20, %v3082_v47 }
 0x444   : > { %1259 = vst [vmem:[#allocation6 + $0x50] sm:$0xff] %v2647_v10  ;;  %1260 = vst [vmem:[#allocation6 + $0x58] sm:$0xff] %v2647_v10 }
 0x445   : > { %1261 = vst [vmem:[#allocation6 + $0x60] sm:$0xff] %v2647_v10  ;;  %1262 = vst [vmem:[#allocation6 + $0x68] sm:$0xff] %v2647_v10  ;;  %2436 = vrot.lane.b32.xlu1 %v2435_v22, %s2646_s11  ;;  %v2447_v22 = vld [vmem:[%s3306_s4 + $0x38] sm:$0xff]  }
 0x446   : > { %1263 = vst [vmem:[#allocation6 + $0x70] sm:$0xff] %v2647_v10  ;;  %1264 = vst [vmem:[#allocation6 + $0x78] sm:$0xff] %v2647_v10 }
 0x497   : > { %v2402_v48 = vpop.permute.xlu1 %2401 }
 0x498   : > { %v2404_v49 = vunpack.i.h.bf16 %v2402_v48  ;;  %v2403_v30 = vunpack.i.l.bf16 %v2402_v48 }
 0x49a   : > { %v1130_v43 = vsel %vm888_vm0, %v3022_v61, %v2404_v49  ;;  %v1129_v41 = vsel %vm888_vm0, %v3019_v60, %v2403_v30 }
 0x49b   : > { %v1145_v26 = vpack.c.bf16 %v1130_v43, %v1129_v41  ;;  %v2407_v52 = vpop.permute.xlu0 %2406 }
 0x49c   : > { %v2409_v53 = vunpack.i.h.bf16 %v2407_v52  ;;  %v2408_v54 = vunpack.i.l.bf16 %v2407_v52 }
 0x49d   : > { %v1217_v56 = vmul.bf16 %v2440_v50, %v1145_v26 }
 0x49e   : > { %v1138_v58 = vsel %vm888_vm0, %v3031_v62, %v2409_v53  ;;  %v1137_v59 = vsel %vm888_vm0, %v3028_v4, %v2408_v54 }
 0x49f   : > { %1225 = vst [vmem:[#allocation3] sm:$0xff] %v1217_v56  ;;  %v1149_v61 = vpack.c.bf16 %v1138_v58, %v1137_v59 }
 0x4a1   : > { %v1221_v63 = vmul.bf16 %v2441_v57, %v1149_v61 }
 0x4a3   : > { %1229 = vst [vmem:[#allocation3 + $0x20] sm:$0xff] %v1221_v63  ;;  %v2412_v60 = vpop.permute.xlu0 %2411 }
 0x4a4   : > { %v2414_v0 = vunpack.i.h.bf16 %v2412_v60  ;;  %v2413_v1 = vunpack.i.l.bf16 %v2412_v60 }
 0x4a6   : > { %v1132_v3 = vsel %vm888_vm0, %v3040_v21, %v2414_v0  ;;  %v1131_v62 = vsel %vm888_vm0, %v3037_v55, %v2413_v1 }
 0x4a7   : > { %v1146_v51 = vpack.c.bf16 %v1132_v3, %v1131_v62  ;;  %v2417_v6 = vpop.permute.xlu1 %2416 }
 0x4a8   : > { %v2419_v4 = vunpack.i.h.bf16 %v2417_v6  ;;  %v2418_v8 = vunpack.i.l.bf16 %v2417_v6 }
 0x4a9   : > { %v1218_v12 = vmul.bf16 %v2442_v2, %v1146_v51 }
 0x4aa   : > { %v1140_v14 = vsel %vm888_vm0, %v3049_v33, %v2419_v4  ;;  %v1139_v15 = vsel %vm888_vm0, %v3046_v32, %v2418_v8 }
 0x4ab   : > { %1226 = vst [vmem:[#allocation3 + $0x8] sm:$0xff] %v1218_v12  ;;  %v1150_v5 = vpack.c.bf16 %v1140_v14, %v1139_v15  ;;  %v2422_v17 = vpop.permute.xlu1 %2421 }
 0x4ac   : > { %v2424_v21 = vunpack.i.h.bf16 %v2422_v17  ;;  %v2423_v55 = vunpack.i.l.bf16 %v2422_v17 }
 0x4ad   : > { %v1222_v25 = vmul.bf16 %v2443_v13, %v1150_v5 }
 0x4ae   : > { %v1134_v28 = vsel %vm888_vm0, %v3058_v9, %v2424_v21  ;;  %v1133_v24 = vsel %vm888_vm0, %v3055_v39, %v2423_v55 }
 0x4af   : > { %1230 = vst [vmem:[#allocation3 + $0x28] sm:$0xff] %v1222_v25  ;;  %v1147_v31 = vpack.c.bf16 %v1134_v28, %v1133_v24  ;;  %v2432_v33 = vpop.permute.xlu0 %2431 }
 0x4b0   : > { %v2434_v32 = vunpack.i.h.bf16 %v2432_v33  ;;  %v2433_v34 = vunpack.i.l.bf16 %v2432_v33 }
 0x4b1   : > { %v1219_v7 = vmul.bf16 %v2444_v27, %v1147_v31 }
 0x4b2   : > { %v1142_v35 = vsel %vm888_vm0, %v3067_v42, %v2434_v32  ;;  %v1141_v40 = vsel %vm888_vm0, %v3064_v36, %v2433_v34 }
 0x4b3   : > { %1227 = vst [vmem:[#allocation3 + $0x10] sm:$0xff] %v1219_v7  ;;  %v1151_v9 = vpack.c.bf16 %v1142_v35, %v1141_v40  ;;  %v2427_v23 = vpop.permute.xlu1 %2426 }
 0x4b4   : > { %v2429_v39 = vunpack.i.h.bf16 %v2427_v23  ;;  %v2428_v11 = vunpack.i.l.bf16 %v2427_v23 }
 0x4b5   : > { %v1223_v37 = vmul.bf16 %v2445_v29, %v1151_v9 }
 0x4b6   : > { %v1136_v16 = vsel %vm888_vm0, %v3076_v38, %v2429_v39  ;;  %v1135_v45 = vsel %vm888_vm0, %v3073_v18, %v2428_v11 }
 0x4b7   : > { %1231 = vst [vmem:[#allocation3 + $0x30] sm:$0xff] %v1223_v37  ;;  %v1148_v42 = vpack.c.bf16 %v1136_v16, %v1135_v45  ;;  %v2437_v19 = vpop.permute.xlu1 %2436 }
 0x4b8   : > { %v2439_v36 = vunpack.i.h.bf16 %v2437_v19  ;;  %v2438_v46 = vunpack.i.l.bf16 %v2437_v19 }
 0x4b9   : > { %v1220_v10 = vmul.bf16 %v2446_v44, %v1148_v42 }
 0x4ba   : > { %v1144_v48 = vsel %vm888_vm0, %v3085_v20, %v2439_v36  ;;  %v1143_v49 = vsel %vm888_vm0, %v3082_v47, %v2438_v46 }
 0x4bb   : > { %1228 = vst [vmem:[#allocation3 + $0x18] sm:$0xff] %v1220_v10  ;;  %v1152_v38 = vpack.c.bf16 %v1144_v48, %v1143_v49 }
 0x4bd   : > { %v1224_v30 = vmul.bf16 %v2447_v22, %v1152_v38 }
 0x4bf   : > { %1232 = vst [vmem:[#allocation3 + $0x38] sm:$0xff] %v1224_v30 }
 0x4c0 PF: > { %p1953_p7 = scmp.ne.s32.totalorder %s2634_s21, 1 }
 0x4c1   : > { %v1284_v18 = vld [vmem:[#allocation3] sm:$0xff] (!%p1953_p7)  ;;  %v1285_v50 = vld [vmem:[#allocation3 + $0x8] sm:$0xff] (!%p1953_p7)  ;;  %v1286_v43 = vld [vmem:[#allocation3 + $0x10] sm:$0xff] (!%p1953_p7) }
 0x4c2   : > { %1267 = sbr.rel (%p1953_p7) target bundleno = 1757 (0x6dd), region = 56  ;;  %2162 = vmatprep.subr.bf16.mxu0 (!%p1953_p7), %v1284_v18  ;;  %1493 = vxpose.xlu0.c.b16.start [1/8] (!%p1953_p7), %v1284_v18, 128  ;;  %v2544_v20 = vld [vmem:[%s3302_s0] sm:$0xff] (!%p1953_p7)   ;;  %v1287_v47 = vld [vmem:[#allocation3 + $0x18] sm:$0xff] (!%p1953_p7)  ;;  %v1289_v26 = vld [vmem:[#allocation3 + $0x28] sm:$0xff] (!%p1953_p7) }
 0x4c3   : > { %2163 = vmatpush3.bf16.msra.mxu0 (!%p1953_p7), %v1284_v18  ;;  %2178 = vmatprep.mubr.bf16.mxu0 (!%p1953_p7), %v2544_v20  ;;  %v1288_v41 = vld [vmem:[#allocation3 + $0x20] sm:$0xff] (!%p1953_p7)  ;;  %v1290_v52 = vld [vmem:[#allocation3 + $0x30] sm:$0xff] (!%p1953_p7)  ;;  %v2545_v54 = vld [vmem:[%s3302_s0 + $0x8] sm:$0xff] (!%p1953_p7)  }
 0x4c4   : > { %2164 = vmatprep.subr.bf16.mxu0 (!%p1953_p7), %v1285_v50  ;;  %v2546_v56 = vld [vmem:[%s3302_s0 + $0x10] sm:$0xff] (!%p1953_p7)   ;;  %v2547_v57 = vld [vmem:[%s3302_s0 + $0x18] sm:$0xff] (!%p1953_p7)   ;;  %v2548_v58 = vld [vmem:[%s3302_s0 + $0x20] sm:$0xff] (!%p1953_p7)  }
 0x4c5   : > { %v2549_v59 = vld [vmem:[%s3302_s0 + $0x28] sm:$0xff] (!%p1953_p7)   ;;  %v2550_v61 = vld [vmem:[%s3302_s0 + $0x30] sm:$0xff] (!%p1953_p7)   ;;  %v2551_v63 = vld [vmem:[%s3302_s0 + $0x38] sm:$0xff] (!%p1953_p7)  }
 0x4c6   : > { %1494 = vxpose.xlu0.c.b16.cont [2/8] (!%p1953_p7), %v1285_v50, 128  ;;  %v1291_v53 = vld [vmem:[#allocation3 + $0x38] sm:$0xff] (!%p1953_p7)  ;;  %v3174_v60 = vld [vmem:[%s3303_s1] sm:$0xff] (!%p1953_p7)   ;;  %v3181_v0 = vld [vmem:[%s3303_s1 + $0x8] sm:$0xff] (!%p1953_p7)  }
 0x4c7   : > { %2165 = vmatpush3.bf16.msra.mxu0 (!%p1953_p7), %v1285_v50  ;;  %v3188_v1 = vld [vmem:[%s3303_s1 + $0x10] sm:$0xff] (!%p1953_p7)   ;;  %v3195_v2 = vld [vmem:[%s3303_s1 + $0x18] sm:$0xff] (!%p1953_p7)   ;;  %v3202_v3 = vld [vmem:[%s3303_s1 + $0x20] sm:$0xff] (!%p1953_p7)  }
 0x4c8   : > { %2166 = vmatprep.subr.bf16.mxu0 (!%p1953_p7), %v1286_v43  ;;  %v3209_v62 = vld [vmem:[%s3303_s1 + $0x28] sm:$0xff] (!%p1953_p7)   ;;  %v3216_v51 = vld [vmem:[%s3303_s1 + $0x30] sm:$0xff] (!%p1953_p7)   ;;  %v3223_v6 = vld [vmem:[%s3303_s1 + $0x38] sm:$0xff] (!%p1953_p7)  }
 0x4c9   : > { %v1640_v36 = vld [vmem:[#allocation6 + $0x10] sm:$0xff]  ;;  %v1638_v46 = vld [vmem:[#allocation6] sm:$0xff]  ;;  %v1641_v30 = vld [vmem:[#allocation6 + $0x18] sm:$0xff] }
 0x4ca   : > { %1495 = vxpose.xlu0.c.b16.cont [3/8] %v1286_v43, 128  ;;  %v1639_v18 = vld [vmem:[#allocation6 + $0x8] sm:$0xff] }
 0x4cb   : > { %2167 = vmatpush3.bf16.msra.mxu0 %v1286_v43 }
 0x4cc   : > { %2168 = vmatprep.subr.bf16.mxu0 %v1287_v47 }
 0x4ce   : > { %1496 = vxpose.xlu0.c.b16.cont [4/8] %v1287_v47, 128 }
 0x4cf   : > { %2169 = vmatpush3.bf16.msra.mxu0 %v1287_v47 }
 0x4d0   : > { %2170 = vmatprep.subr.bf16.mxu0 %v1288_v41 }
 0x4d2   : > { %1497 = vxpose.xlu0.c.b16.cont [5/8] %v1288_v41, 128 }
 0x4d3   : > { %2171 = vmatpush3.bf16.msra.mxu0 %v1288_v41  ;;  %v1644_v41 = vld [vmem:[#allocation6 + $0x30] sm:$0xff] }
 0x4d4   : > { %2172 = vmatprep.subr.bf16.mxu0 %v1289_v26 }
 0x4d6   : > { %1498 = vxpose.xlu0.c.b16.cont [6/8] %v1289_v26, 128 }
 0x4d7   : > { %2173 = vmatpush3.bf16.msra.mxu0 %v1289_v26  ;;  %v1642_v26 = vld [vmem:[#allocation6 + $0x20] sm:$0xff] }
 0x4d8   : > { %2174 = vmatprep.subr.bf16.mxu0 %v1290_v52 }
 0x4da   : > { %1499 = vxpose.xlu0.c.b16.cont [7/8] %v1290_v52, 128 }
 0x4db   : > { %2175 = vmatpush3.bf16.msra.mxu0 %v1290_v52 }
 0x4dc   : > { %2176 = vmatprep.subr.bf16.mxu0 %v1291_v53 }
 0x4de   : > { %1500 = vxpose.xlu0.c.b16.end [8/8] %v1291_v53, 128 }
 0x4df   : > { %2177 = vmatpush3.bf16.msra.mxu0 %v1291_v53 }
 0x4e0   : > { %2226 = vmatprep.subr.bf16.mxu0 %v3174_v60 }
 0x4e2   : > { %2179 = vmatmul.mubr.bf16.vlgmr.msra.gmra.mrb[0].mxu0 %v2545_v54 }
 0x4e3   : > { %2182 = vmatprep.mubr.bf16.mxu0 %v2546_v56  ;;  %2227 = vmatpush3.bf16.msra.mxu0 %v3174_v60 }
 0x4e4   : > { %2228 = vmatprep.subr.bf16.mxu0 %v3181_v0 }
 0x4e7   : > { %2229 = vmatpush3.bf16.msra.mxu0 %v3181_v0 }
 0x4e8   : > { %2230 = vmatprep.subr.bf16.mxu0 %v3188_v1 }
 0x4ea   : > { %2183 = vmatmul.mubr.bf16.gmra.mrb[4].mxu0 %v2547_v57  ;;  %v1645_v57 = vld [vmem:[#allocation6 + $0x38] sm:$0xff] }
 0x4eb   : > { %2186 = vmatprep.mubr.bf16.mxu0 %v2548_v58  ;;  %2231 = vmatpush3.bf16.msra.mxu0 %v3188_v1  ;;  %v1643_v58 = vld [vmem:[#allocation6 + $0x28] sm:$0xff] }
 0x4ec   : > { %2232 = vmatprep.subr.bf16.mxu0 %v3195_v2 }
 0x4ef   : > { %2233 = vmatpush3.bf16.msra.mxu0 %v3195_v2 }
 0x4f0   : > { %2234 = vmatprep.subr.bf16.mxu0 %v3202_v3 }
 0x4f2   : > { %2187 = vmatmul.mubr.bf16.gmra.mrb[8].mxu0 %v2549_v59 }
 0x4f3   : > { %2190 = vmatprep.mubr.bf16.mxu0 %v2550_v61  ;;  %2235 = vmatpush3.bf16.msra.mxu0 %v3202_v3 }
 0x4f4   : > { %2236 = vmatprep.subr.bf16.mxu0 %v3209_v62 }
 0x4f7   : > { %2237 = vmatpush3.bf16.msra.mxu0 %v3209_v62 }
 0x4f8   : > { %2238 = vmatprep.subr.bf16.mxu0 %v3216_v51 }
 0x4fa   : > { %2191 = vmatmul.mubr.bf16.gmra.mrb[12].mxu0 %v2551_v63 }
 0x4fb   : > { %2239 = vmatpush3.bf16.msra.mxu0 %v3216_v51 }
 0x4fc   : > { %2240 = vmatprep.subr.bf16.mxu0 %v3223_v6 }
 0x4ff   : > { %2241 = vmatpush3.bf16.msra.mxu0 %v3223_v6 }
 0x528   : > { %v1501_v4 = vpop.trf.xlu0 }
 0x529   : > { %2210 = vmatprep.mubr.bf16.mxu1 %v1501_v4  ;;  %2242 = vmatprep.mubr.bf16.mxu0 %v1501_v4 }
 0x52c   : > { %v1502_v8 = vpop.trf.xlu0 }
 0x52d   : > { %2243 = vmatmul.mubr.bf16.vlgmr.msra.gmra.mrb[16].mxu0 %v1502_v8 }
 0x530   : > { %v1503_v12 = vpop.trf.xlu0 }
 0x531   : > { %2246 = vmatprep.mubr.bf16.mxu0 %v1503_v12 }
 0x534   : > { %v1504_v13 = vpop.trf.xlu0 }
 0x535   : > { %2247 = vmatmul.mubr.bf16.gmra.mrb[20].mxu0 %v1504_v13 }
 0x538   : > { %v1505_v16 = vpop.trf.xlu0 }
 0x53c   : > { %v1506_v45 = vpop.trf.xlu0 }
 0x540   : > { %v1507_v42 = vpop.trf.xlu0 }
 0x544   : > { %v1508_v19 = vpop.trf.xlu0 }
 0x5b5   : > { %v2180_v14 = vpop.f32.mrb[0].mxu0 }
 0x5b6   : > { %v1374_v15 = vpop.f32.mrb[1].mxu0 }
 0x5b7   : > { %v2181_v5 = vpop.f32.mrb[2].mxu0 }
 0x5b8   : > { %v1486_v17 = vpack.c.bf16 %v2181_v5, %v2180_v14  ;;  %v1377_v21 = vpop.f32.mrb[3].mxu0  ;;  %v1475_v14 = vld [vmem:[#allocation4 + $0x30] sm:$0xff] }
 0x5b9   : > { %v1485_v55 = vpack.c.bf16 %v1377_v21, %v1374_v15  ;;  %v1473_v15 = vld [vmem:[#allocation4 + $0x20] sm:$0xff] }
 0x5bb   : > { %2194 = vmatprep.subr.bf16.mxu1 %v1485_v55 }
 0x5bc   : > { %2195 = vmatpush3.bf16.msra.mxu1 %v1485_v55 }
 0x5bd   : > { %v2184_v25 = vpop.f32.mrb[4].mxu0  ;;  %2196 = vmatprep.subr.bf16.mxu1 %v1486_v17 }
 0x5be   : > { %v1390_v27 = vpop.f32.mrb[5].mxu0 }
 0x5bf   : > { %v2185_v28 = vpop.f32.mrb[6].mxu0 }
 0x5c0   : > { %v1488_v24 = vpack.c.bf16 %v2185_v28, %v2184_v25  ;;  %v1393_v31 = vpop.f32.mrb[7].mxu0  ;;  %2197 = vmatpush3.bf16.msra.mxu1 %v1486_v17  ;;  %v1476_v17 = vld [vmem:[#allocation4 + $0x38] sm:$0xff]  ;;  %v1474_v25 = vld [vmem:[#allocation4 + $0x28] sm:$0xff] }
 0x5c1   : > { %v1487_v33 = vpack.c.bf16 %v1393_v31, %v1390_v27 }
 0x5c3   : > { %2198 = vmatprep.subr.bf16.mxu1 %v1487_v33 }
 0x5c4   : > { %2199 = vmatpush3.bf16.msra.mxu1 %v1487_v33 }
 0x5c5   : > { %v2188_v32 = vpop.f32.mrb[8].mxu0  ;;  %2200 = vmatprep.subr.bf16.mxu1 %v1488_v24 }
 0x5c6   : > { %v1406_v34 = vpop.f32.mrb[9].mxu0 }
 0x5c7   : > { %v2189_v7 = vpop.f32.mrb[10].mxu0 }
 0x5c8   : > { %v1490_v29 = vpack.c.bf16 %v2189_v7, %v2188_v32  ;;  %v1409_v35 = vpop.f32.mrb[11].mxu0  ;;  %2201 = vmatpush3.bf16.msra.mxu1 %v1488_v24  ;;  %v1479_v32 = vld [vmem:[#allocation4 + $0x50] sm:$0xff] }
 0x5c9   : > { %v1489_v40 = vpack.c.bf16 %v1409_v35, %v1406_v34  ;;  %v1477_v34 = vld [vmem:[#allocation4 + $0x40] sm:$0xff] }
 0x5cb   : > { %2202 = vmatprep.subr.bf16.mxu1 %v1489_v40 }
 0x5cc   : > { %2203 = vmatpush3.bf16.msra.mxu1 %v1489_v40 }
 0x5cd   : > { %v2192_v9 = vpop.f32.mrb[12].mxu0  ;;  %2204 = vmatprep.subr.bf16.mxu1 %v1490_v29 }
 0x5ce   : > { %v1422_v23 = vpop.f32.mrb[13].mxu0 }
 0x5cf   : > { %v2193_v39 = vpop.f32.mrb[14].mxu0 }
 0x5d0   : > { %v1492_v11 = vpack.c.bf16 %v2193_v39, %v2192_v9  ;;  %v1425_v37 = vpop.f32.mrb[15].mxu0  ;;  %2205 = vmatpush3.bf16.msra.mxu1 %v1490_v29  ;;  %v1480_v29 = vld [vmem:[#allocation4 + $0x58] sm:$0xff]  ;;  %v1478_v9 = vld [vmem:[#allocation4 + $0x48] sm:$0xff] }
 0x5d1   : > { %v1491_v44 = vpack.c.bf16 %v1425_v37, %v1422_v23 }
 0x5d3   : > { %2206 = vmatprep.subr.bf16.mxu1 %v1491_v44 }
 0x5d4   : > { %2207 = vmatpush3.bf16.msra.mxu1 %v1491_v44 }
 0x5d5   : > { %2208 = vmatprep.subr.bf16.mxu1 %v1492_v11 }
 0x5d8   : > { %2209 = vmatpush3.bf16.msra.mxu1 %v1492_v11 }
 0x5d9   : > { %2322 = vmatprep.subr.bf16.mxu1 %v3174_v60 }
 0x5db   : > { %2211 = vmatmul.mubr.bf16.vlgmr.msra.gmra.mrb[0].mxu1 %v1502_v8 }
 0x5dc   : > { %2330 = vmatpush3.bf16.msra.mxu1 %v3174_v60  ;;  %2214 = vmatprep.mubr.bf16.mxu1 %v1503_v12  ;;  %v1471_v60 = vld [vmem:[#allocation4 + $0x10] sm:$0xff] }
 0x5dd   : > { %2323 = vmatprep.subr.bf16.mxu1 %v3181_v0 }
 0x5e0   : > { %2331 = vmatpush3.bf16.msra.mxu1 %v3181_v0  ;;  %v1469_v0 = vld [vmem:[#allocation4] sm:$0xff] }
 0x5e1   : > { %2324 = vmatprep.subr.bf16.mxu1 %v3188_v1 }
 0x5e3   : > { %2215 = vmatmul.mubr.bf16.gmra.mrb[4].mxu1 %v1504_v13 }
 0x5e4   : > { %2332 = vmatpush3.bf16.msra.mxu1 %v3188_v1  ;;  %2218 = vmatprep.mubr.bf16.mxu1 %v1505_v16 }
 0x5e5   : > { %2325 = vmatprep.subr.bf16.mxu1 %v3195_v2 }
 0x5e8   : > { %2333 = vmatpush3.bf16.msra.mxu1 %v3195_v2  ;;  %v1472_v2 = vld [vmem:[#allocation4 + $0x18] sm:$0xff] }
 0x5e9   : > { %2326 = vmatprep.subr.bf16.mxu1 %v3202_v3 }
 0x5eb   : > { %2219 = vmatmul.mubr.bf16.gmra.mrb[8].mxu1 %v1506_v45 }
 0x5ec   : > { %2334 = vmatpush3.bf16.msra.mxu1 %v3202_v3  ;;  %2222 = vmatprep.mubr.bf16.mxu1 %v1507_v42 }
 0x5ed   : > { %2327 = vmatprep.subr.bf16.mxu1 %v3209_v62 }
 0x5f0   : > { %2335 = vmatpush3.bf16.msra.mxu1 %v3209_v62 }
 0x5f1   : > { %2328 = vmatprep.subr.bf16.mxu1 %v3216_v51 }
 0x5f3   : > { %2223 = vmatmul.mubr.bf16.gmra.mrb[12].mxu1 %v1508_v19 }
 0x5f4   : > { %2336 = vmatpush3.bf16.msra.mxu1 %v3216_v51  ;;  %2250 = vmatprep.mubr.bf16.mxu1 %v1505_v16  ;;  %v1470_v51 = vld [vmem:[#allocation4 + $0x8] sm:$0xff]  ;;  %v1483_v16 = vld [vmem:[#allocation4 + $0x70] sm:$0xff] }
 0x5f5   : > { %2329 = vmatprep.subr.bf16.mxu1 %v3223_v6 }
 0x5f8   : > { %2337 = vmatpush3.bf16.msra.mxu1 %v3223_v6 }
 0x5fb   : > { %2251 = vmatmul.mubr.bf16.vlgmr.msra.gmra.mrb[16].mxu1 %v1506_v45  ;;  %v1481_v45 = vld [vmem:[#allocation4 + $0x60] sm:$0xff] }
 0x5fc   : > { %2254 = vmatprep.mubr.bf16.mxu1 %v1507_v42 }
 0x600   : > { %v2244_v10 = vpop.f32.mrb[16].mxu0 }
 0x601   : > { %v1801_v22 = vadd.f32 %v2244_v10, %v1640_v36  ;;  %v1736_v48 = vpop.f32.mrb[17].mxu0  ;;  %v1482_v10 = vld [vmem:[#allocation4 + $0x68] sm:$0xff] }
 0x602   : > { %v1799_v49 = vadd.f32 %v1736_v48, %v1638_v46  ;;  %v2245_v38 = vpop.f32.mrb[18].mxu0 }
 0x603   : > { %2255 = vmatmul.mubr.bf16.gmra.mrb[20].mxu1 %v1508_v19  ;;  %1817 = vst [vmem:[#allocation6 + $0x10] sm:$0xff] %v1801_v22  ;;  %v1739_v50 = vpop.f32.mrb[19].mxu0  ;;  %v1802_v20 = vadd.f32 %v2245_v38, %v1641_v30  ;;  %v1484_v19 = vld [vmem:[#allocation4 + $0x78] sm:$0xff] }
 0x604   : > { %1815 = vst [vmem:[#allocation6] sm:$0xff] %v1799_v49  ;;  %v1800_v43 = vadd.f32 %v1739_v50, %v1639_v18  ;;  %v1648_v18 = vld [vmem:[#allocation6 + $0x50] sm:$0xff]  ;;  %v1646_v50 = vld [vmem:[#allocation6 + $0x40] sm:$0xff] }
 0x605   : > { %1818 = vst [vmem:[#allocation6 + $0x18] sm:$0xff] %v1802_v20 }
 0x606   : > { %1816 = vst [vmem:[#allocation6 + $0x8] sm:$0xff] %v1800_v43  ;;  %v1649_v43 = vld [vmem:[#allocation6 + $0x58] sm:$0xff] }
 0x608   : > { %v2248_v47 = vpop.f32.mrb[20].mxu0 }
 0x609   : > { %v1752_v52 = vpop.f32.mrb[21].mxu0  ;;  %v1805_v53 = vadd.f32 %v2248_v47, %v1644_v41 }
 0x60a   : > { %v1803_v54 = vadd.f32 %v1752_v52, %v1642_v26  ;;  %v2249_v56 = vpop.f32.mrb[22].mxu0  ;;  %v1647_v26 = vld [vmem:[#allocation6 + $0x48] sm:$0xff] }
 0x60b   : > { %v1755_v59 = vpop.f32.mrb[23].mxu0  ;;  %1821 = vst [vmem:[#allocation6 + $0x30] sm:$0xff] %v1805_v53  ;;  %v1806_v61 = vadd.f32 %v2249_v56, %v1645_v57 }
 0x60c   : > { %1819 = vst [vmem:[#allocation6 + $0x20] sm:$0xff] %v1803_v54  ;;  %v1804_v63 = vadd.f32 %v1755_v59, %v1643_v58  ;;  %v1652_v58 = vld [vmem:[#allocation6 + $0x70] sm:$0xff]  ;;  %v1650_v59 = vld [vmem:[#allocation6 + $0x60] sm:$0xff] }
 0x60d   : > { %1822 = vst [vmem:[#allocation6 + $0x38] sm:$0xff] %v1806_v61 }
 0x60e   : > { %1820 = vst [vmem:[#allocation6 + $0x28] sm:$0xff] %v1804_v63  ;;  %v1653_v63 = vld [vmem:[#allocation6 + $0x78] sm:$0xff] }
 0x6ae   : > { %v2212_v1 = vpop.f32.mrb[0].mxu1 }
 0x6af   : > { %v1608_v3 = vadd.f32 %v2212_v1, %v1471_v60  ;;  %v1543_v62 = vpop.f32.mrb[1].mxu1  ;;  %v1651_v1 = vld [vmem:[#allocation6 + $0x68] sm:$0xff] }
 0x6b0   : > { %v1606_v6 = vadd.f32 %v1543_v62, %v1469_v0  ;;  %v2213_v4 = vpop.f32.mrb[2].mxu1 }
 0x6b1   : > { %1624 = vst [vmem:[#allocation4 + $0x10] sm:$0xff] %v1608_v3  ;;  %v1609_v8 = vadd.f32 %v2213_v4, %v1472_v2  ;;  %v1546_v12 = vpop.f32.mrb[3].mxu1 }
 0x6b2   : > { %1622 = vst [vmem:[#allocation4] sm:$0xff] %v1606_v6  ;;  %v1607_v13 = vadd.f32 %v1546_v12, %v1470_v51 }
 0x6b3   : > { %1625 = vst [vmem:[#allocation4 + $0x18] sm:$0xff] %v1609_v8 }
 0x6b4   : > { %1623 = vst [vmem:[#allocation4 + $0x8] sm:$0xff] %v1607_v13 }
 0x6b6   : > { %v2216_v5 = vpop.f32.mrb[4].mxu1 }
 0x6b7   : > { %v1612_v21 = vadd.f32 %v2216_v5, %v1475_v14  ;;  %v1559_v55 = vpop.f32.mrb[5].mxu1 }
 0x6b8   : > { %v1610_v27 = vadd.f32 %v1559_v55, %v1473_v15  ;;  %v2217_v28 = vpop.f32.mrb[6].mxu1 }
 0x6b9   : > { %1628 = vst [vmem:[#allocation4 + $0x30] sm:$0xff] %v1612_v21  ;;  %v1613_v24 = vadd.f32 %v2217_v28, %v1476_v17  ;;  %v1562_v31 = vpop.f32.mrb[7].mxu1 }
 0x6ba   : > { %1626 = vst [vmem:[#allocation4 + $0x20] sm:$0xff] %v1610_v27  ;;  %v1611_v33 = vadd.f32 %v1562_v31, %v1474_v25 }
 0x6bb   : > { %1629 = vst [vmem:[#allocation4 + $0x38] sm:$0xff] %v1613_v24 }
 0x6bc   : > { %1627 = vst [vmem:[#allocation4 + $0x28] sm:$0xff] %v1611_v33 }
 0x6be   : > { %v2220_v7 = vpop.f32.mrb[8].mxu1 }
 0x6bf   : > { %v1616_v35 = vadd.f32 %v2220_v7, %v1479_v32  ;;  %v1575_v40 = vpop.f32.mrb[9].mxu1 }
 0x6c0   : > { %v1614_v23 = vadd.f32 %v1575_v40, %v1477_v34  ;;  %v2221_v39 = vpop.f32.mrb[10].mxu1 }
 0x6c1   : > { %1632 = vst [vmem:[#allocation4 + $0x50] sm:$0xff] %v1616_v35  ;;  %v1617_v11 = vadd.f32 %v2221_v39, %v1480_v29  ;;  %v1578_v37 = vpop.f32.mrb[11].mxu1 }
 0x6c2   : > { %1630 = vst [vmem:[#allocation4 + $0x40] sm:$0xff] %v1614_v23  ;;  %v1615_v44 = vadd.f32 %v1578_v37, %v1478_v9 }
 0x6c3   : > { %1633 = vst [vmem:[#allocation4 + $0x58] sm:$0xff] %v1617_v11 }
 0x6c4   : > { %1631 = vst [vmem:[#allocation4 + $0x48] sm:$0xff] %v1615_v44 }
 0x6c6   : > { %v2224_v42 = vpop.f32.mrb[12].mxu1 }
 0x6c7   : > { %v1620_v36 = vadd.f32 %v2224_v42, %v1483_v16  ;;  %v1591_v46 = vpop.f32.mrb[13].mxu1 }
 0x6c8   : > { %v1618_v22 = vadd.f32 %v1591_v46, %v1481_v45  ;;  %v2225_v48 = vpop.f32.mrb[14].mxu1 }
 0x6c9   : > { %1636 = vst [vmem:[#allocation4 + $0x70] sm:$0xff] %v1620_v36  ;;  %v1621_v49 = vadd.f32 %v2225_v48, %v1484_v19  ;;  %v1594_v38 = vpop.f32.mrb[15].mxu1 }
 0x6ca   : > { %1634 = vst [vmem:[#allocation4 + $0x60] sm:$0xff] %v1618_v22  ;;  %v1619_v30 = vadd.f32 %v1594_v38, %v1482_v10 }
 0x6cb   : > { %1637 = vst [vmem:[#allocation4 + $0x78] sm:$0xff] %v1621_v49 }
 0x6cc   : > { %1635 = vst [vmem:[#allocation4 + $0x68] sm:$0xff] %v1619_v30 }
 0x6ce   : > { %v2252_v20 = vpop.f32.mrb[16].mxu1 }
 0x6cf   : > { %v1809_v47 = vadd.f32 %v2252_v20, %v1648_v18  ;;  %v1768_v41 = vpop.f32.mrb[17].mxu1 }
 0x6d0   : > { %v1807_v52 = vadd.f32 %v1768_v41, %v1646_v50  ;;  %v2253_v53 = vpop.f32.mrb[18].mxu1 }
 0x6d1   : > { %1825 = vst [vmem:[#allocation6 + $0x50] sm:$0xff] %v1809_v47  ;;  %v1810_v54 = vadd.f32 %v2253_v53, %v1649_v43  ;;  %v1771_v56 = vpop.f32.mrb[19].mxu1 }
 0x6d2   : > { %1823 = vst [vmem:[#allocation6 + $0x40] sm:$0xff] %v1807_v52  ;;  %v1808_v57 = vadd.f32 %v1771_v56, %v1647_v26 }
 0x6d3   : > { %1826 = vst [vmem:[#allocation6 + $0x58] sm:$0xff] %v1810_v54 }
 0x6d4   : > { %1824 = vst [vmem:[#allocation6 + $0x48] sm:$0xff] %v1808_v57 }
 0x6d6   : > { %v2256_v61 = vpop.f32.mrb[20].mxu1 }
 0x6d7   : > { %v1813_v60 = vadd.f32 %v2256_v61, %v1652_v58  ;;  %v1784_v0 = vpop.f32.mrb[21].mxu1 }
 0x6d8   : > { %v1811_v2 = vadd.f32 %v1784_v0, %v1650_v59  ;;  %v2257_v3 = vpop.f32.mrb[22].mxu1 }
 0x6d9   : > { %1829 = vst [vmem:[#allocation6 + $0x70] sm:$0xff] %v1813_v60  ;;  %v1814_v62 = vadd.f32 %v2257_v3, %v1653_v63  ;;  %v1787_v51 = vpop.f32.mrb[23].mxu1 }
 0x6da   : > { %1827 = vst [vmem:[#allocation6 + $0x60] sm:$0xff] %v1811_v2  ;;  %v1812_v6 = vadd.f32 %v1787_v51, %v1651_v1 }
 0x6db   : > { %1830 = vst [vmem:[#allocation6 + $0x78] sm:$0xff] %v1814_v62 }
 0x6dc   : > { %1828 = vst [vmem:[#allocation6 + $0x68] sm:$0xff] %v1812_v6 }
 0x6dd PF: > { %p3245_p8 = scmp.eq.s32.totalorder %s1921_s24, 1  ;;  %s2648_s26 = smov [#allocation4]  }
 0x6de   : > { %s1837_s27 = sshll.u32 %s2648_s26, 4  ;;  %s1838_s27 = int_to_ptr.vmem [resolvable:$true] %s1837_s27 }
 0x6df   : > { %s2560_s28 = scalar_lea.vmem %s1838_s27, 2048  ;;  %p2567_p12 = scmp.lt.s32.totalorder %s1838_s27, %s1838_s27 }
 0x6e0   : > { %p2561_p9 = scmp.ne.s32.totalorder %s1838_s27, %s2560_s28  ;;  %p2568_p13 = scmp.lt.s32.totalorder %s2560_s28, %s2560_s28 }
 0x6e2   : > { %p2562_p10 = pnand %p2561_p9, %p3245_p8  ;;  %p2569_p0 = por %p2568_p13, %p2567_p12 }
 0x6e4   : > { %p2563_p11 = pneg %p2562_p10 }
 0x6e6   : > { %p2570_p1 = pnand %p2569_p0, %p2563_p11 }
 0x6e8   : > { %2573 = shalt.err (!%p2570_p1)
}
 0x6e9   : > { %s2574_s24 = scalar_lea.hbm %s3307_s5, 2048 }
 0x6ea   : > { %p2575_p2 = scmp.ne.s32.totalorder %s3307_s5, %s2574_s24  ;;  %p2580_p5 = scmp.lt.u32.totalorder %s2574_s24, %s3307_s5 }
 0x6ec   : > { %p2576_p3 = pnand %p2575_p2, %p3245_p8 }
 0x6ee   : > { %p2577_p4 = pneg %p2576_p3 }
 0x6f0   : > { %p2582_p6 = pnand %p2580_p5, %p2577_p4 }
 0x6f2   : > { %2585 = shalt.err (!%p2582_p6)
}
 0x6f3   : > { %s2649_s21 = smov 128   ;;  %s2650_s11 = smov 8  }
 0x6f4   : > { %2339 = dma.vmem_to_hbm [thread:$0]  (%p3245_p8), %s1838_s27, 2048, %s3307_s5, [#allocation5], %s2649_s21, %s2649_s21, %s2650_s11  }
 0x6f5   : > { %s2651_s14 = smov [#allocation6]  }
 0x6f6   : > { %s1850_s15 = sshll.u32 %s2651_s14, 4  ;;  %s1851_s15 = int_to_ptr.vmem [resolvable:$true] %s1850_s15 }
 0x6f7   : > { %s2586_s16 = scalar_lea.vmem %s1851_s15, 2048  ;;  %p2593_p11 = scmp.lt.s32.totalorder %s1851_s15, %s1851_s15 }
 0x6f8   : > { %p2587_p7 = scmp.ne.s32.totalorder %s1851_s15, %s2586_s16  ;;  %p2594_p12 = scmp.lt.s32.totalorder %s2586_s16, %s2586_s16 }
 0x6fa   : > { %p2588_p9 = pnand %p2587_p7, %p3245_p8  ;;  %p2595_p13 = por %p2594_p12, %p2593_p11 }
 0x6fc   : > { %p2589_p10 = pneg %p2588_p9 }
 0x6fe   : > { %p2596_p0 = pnand %p2595_p13, %p2589_p10 }
 0x700   : > { %2599 = shalt.err (!%p2596_p0)
}
 0x701   : > { %s2600_s19 = scalar_lea.hbm %s3308_s6, 2048 }
 0x702   : > { %p2601_p1 = scmp.ne.s32.totalorder %s3308_s6, %s2600_s19  ;;  %p2606_p4 = scmp.lt.u32.totalorder %s2600_s19, %s3308_s6 }
 0x704   : > { %p2602_p2 = pnand %p2601_p1, %p3245_p8 }
 0x706   : > { %p2603_p3 = pneg %p2602_p2 }
 0x708   : > { %p2608_p5 = pnand %p2606_p4, %p2603_p3 }
 0x70a   : > { %2611 = shalt.err (!%p2608_p5)
}
 0x70b   : > { %2341 = dma.vmem_to_hbm [thread:$0]  (%p3245_p8), %s1851_s15, 2048, %s3308_s6, [#allocation7], %s2649_s21, %s2649_s21, %s2650_s11  }
 0x70c   : > { %2625 = dma.done.wait (%p3245_p8), [#allocation5], 2048  }
 0x70d   : > { %2627 = vsyncadd (%p3245_p8), [#allocation5], 4294965248 }
 0x70e   : > { %2629 = dma.done.wait (%p3245_p8), [#allocation7], 2048  }
 0x70f   : > { %2631 = vsyncadd (%p3245_p8), [#allocation7], 4294965248 }
 0x710 PF: > { %s19_s23 = sadd.s32 1, %s2642_s23   ;;  %s3310_s21 = smov %s2638_s22 }
 0x711   : > { %p16_p6 = scmp.ge.s32.totalorder %s19_s23, 4   ;;  %s3311_s22 = smov %s3313_s25 }
 0x713   :  { %18 = sbr.rel (!%p16_p6) target bundleno = 3 (0x3), region = 94 }
 0x71a   :  { %1870 = vsyncpa [#allocation5], 1 }
 0x71b   :  { %1872 = vsyncpa [#allocation5 + $0x1], 1 }
 0x71c   :  { %1873 = vsyncpa [#allocation7], 1 }

</bundles_post_ra>
